<compile_context>
chip_gen: v7x
topology: tpu7x:2x2x1
jax: 0.10.0
libtpu: 0.0.40
codegen_flags: <defaults>
</compile_context>

<pallas_src>
import jax
import jax.numpy as jnp
from jax.experimental import pallas as pl
from jax.experimental.pallas import tpu as pltpu

hidden_dim = 256
image_dim = 28 * 28            # 784
latent_dim = 100
num_classes = 10
in_dim = latent_dim + num_classes   # 110

# Padded (lane-aligned) dims used inside the kernel.
K_PAD = 128                    # 110 -> 128 (fills the MXU contraction)
H2 = 512
OUT_PAD = 896                  # 784 -> 7 * 128 (matmul only; store is 784)
MAX_TB = 512                   # max batch tile (rows per grid step)
MIN_TB = 16                    # bf16 packs 16 rows per sublane-packed vreg


def _round_up(x, m):
    return ((x + m - 1) // m) * m


def _choose_tiling(batch):
    """Pick (TB, n_tiles) minimizing padding; >=2 tiles for mid/large B."""
    n_tiles = -(-batch // MAX_TB)                    # ceil div
    if n_tiles == 1 and batch >= 2 * MIN_TB:
        n_tiles = 2                                  # keep v7x's 2nd TC busy
    tb = _round_up(-(-batch // n_tiles), MIN_TB)
    return tb, n_tiles


def _generator_mlp_kernel(x_ref, w1_ref, b1_ref, w2_ref, b2_ref,
                          w3_ref, b3_ref, o_ref):
    # Layer 1: Linear(128 -> 256) + LeakyReLU(0.2)   (K padded with zeros)
    h = jnp.dot(x_ref[...], w1_ref[...],
                preferred_element_type=jnp.float32) + b1_ref[...]
    h = jnp.maximum(h, 0.2 * h)
    # Layer 2: Linear(256 -> 512) + LeakyReLU(0.2)
    h = jnp.dot(h.astype(jnp.bfloat16), w2_ref[...],
                preferred_element_type=jnp.float32) + b2_ref[...]
    h = jnp.maximum(h, 0.2 * h)
    # Layer 3: Linear(512 -> 896 padded) + Tanh, stored at the true 784 width.
    h = jnp.dot(h.astype(jnp.bfloat16), w3_ref[...],
                preferred_element_type=jnp.float32) + b3_ref[...]
    o_ref[...] = jnp.tanh(h[:, :image_dim])


def _pack_params(params):
    """Pad weights to lane-aligned shapes, cast weights to bf16 (biases f32)."""
    w1 = jnp.zeros((K_PAD, hidden_dim), jnp.bfloat16)
    w1 = w1.at[:in_dim, :].set(params["w1"].astype(jnp.bfloat16))
    b1 = params["b1"].astype(jnp.float32)                       # (1, 256)

    w2 = params["w2"].astype(jnp.bfloat16)                      # (256, 512)
    b2 = params["b2"].astype(jnp.float32)                       # (1, 512)

    w3 = jnp.zeros((H2, OUT_PAD), jnp.bfloat16)
    w3 = w3.at[:, :image_dim].set(params["w3"].astype(jnp.bfloat16))
    b3 = jnp.zeros((1, OUT_PAD), jnp.float32)
    b3 = b3.at[:, :image_dim].set(params["b3"].astype(jnp.float32))
    return w1, b1, w2, b2, w3, b3


def generator_forward(noise, labels, params):
    """Forward pass matching the PyTorch Generator.

    noise:  (B, latent_dim) float32
    labels: (B,) int32 in [0, num_classes)
    returns (B, 1, 28, 28) float32
    """
    emb = params["label_emb"]                                   # (10, 10)
    label_input = jnp.take(emb, labels, axis=0)                 # (B, 10) glue
    gen_input = jnp.concatenate([noise, label_input], axis=1)   # (B, 110)

    B = gen_input.shape[0]
    TB, n_tiles = _choose_tiling(B)
    B_pad = TB * n_tiles

    # Zero-pad batch to n_tiles*TB and features 110 -> 128; cast to bf16.
    x = jnp.pad(gen_input, ((0, B_pad - B), (0, K_PAD - in_dim)))
    x = x.astype(jnp.bfloat16)

    w1, b1, w2, b2, w3, b3 = _pack_params(params)

    # Resident, single-buffered weight/bias specs: same (0,0) block every step.
    def resident(shape):
        return pl.BlockSpec(shape, lambda i: (0, 0),
                            pipeline_mode=pl.Buffered(1))

    flops = 2 * B_pad * (K_PAD * hidden_dim + hidden_dim * H2 + H2 * OUT_PAD)
    bytes_accessed = (
        x.size * 2                                   # bf16 input
        + (w1.size + w2.size + w3.size) * 2          # bf16 weights
        + (b1.size + b2.size + b3.size) * 4          # f32 biases
        + B_pad * image_dim * 4                      # f32 output (784-wide)
    )
    cost = pl.CostEstimate(flops=flops,
                           transcendentals=B_pad * image_dim,
                           bytes_accessed=bytes_accessed)

    img_flat = pl.pallas_call(
        _generator_mlp_kernel,
        out_shape=jax.ShapeDtypeStruct((B_pad, image_dim), jnp.float32),
        grid=(n_tiles,),
        in_specs=[
            pl.BlockSpec((TB, K_PAD), lambda i: (i, 0)),   # activations (tiled)
            resident((K_PAD, hidden_dim)),                 # w1
            resident((1, hidden_dim)),                     # b1
            resident((hidden_dim, H2)),                    # w2
            resident((1, H2)),                             # b2
            resident((H2, OUT_PAD)),                       # w3
            resident((1, OUT_PAD)),                        # b3
        ],
        # 784 equals the full last dim of the output array, so it is legal.
        out_specs=pl.BlockSpec((TB, image_dim), lambda i: (i, 0)),
        compiler_params=pltpu.CompilerParams(
            dimension_semantics=("parallel",),
            vmem_limit_bytes=32 * 1024 * 1024),
        cost_estimate=cost,
    )(x, w1, b1, w2, b2, w3, b3)

    # Drop batch padding only (no lane slice needed), reshape to NCHW.
    return img_flat[:B].reshape(B, 1, 28, 28)


def init_params(key):
    """Deterministic synthetic parameters (shapes from the module __init__).

    Weights are stored as (in_features, out_features) so the kernel can use
    x @ W directly (PyTorch stores the transpose)."""
    ks = jax.random.split(key, 7)
    scale = 0.02
    return {
        "label_emb": scale * jax.random.normal(ks[0], (num_classes, num_classes), jnp.float32),
        "w1": scale * jax.random.normal(ks[1], (in_dim, hidden_dim), jnp.float32),
        "b1": scale * jax.random.normal(ks[2], (1, hidden_dim), jnp.float32),
        "w2": scale * jax.random.normal(ks[3], (hidden_dim, H2), jnp.float32),
        "b2": scale * jax.random.normal(ks[4], (1, H2), jnp.float32),
        "w3": scale * jax.random.normal(ks[5], (H2, image_dim), jnp.float32),
        "b3": scale * jax.random.normal(ks[6], (1, image_dim), jnp.float32),
    }


if __name__ == "__main__":
    key = jax.random.PRNGKey(0)
    pkey, nkey, lkey = jax.random.split(key, 3)

    B = 8
    params = init_params(pkey)
    noise = jax.random.normal(nkey, (B, latent_dim), jnp.float32)
    labels = jax.random.randint(lkey, (B,), 0, num_classes, jnp.int32)

    img = generator_forward(noise, labels, params)
    jax.block_until_ready(img)

    assert img.shape == (B, 1, 28, 28), img.shape
    assert img.dtype == jnp.float32
    assert bool(jnp.all(jnp.isfinite(img)))
    assert bool(jnp.all(jnp.abs(img) <= 1.0))  # tanh range

    # Cross-check against a pure-JAX f32 reference.
    # NOTE: weights/activations run through bf16 inside the kernel (intentional
    # precision choice for the MXU); tolerance below covers the ~1e-2 error.
    lbl = jnp.take(params["label_emb"], labels, axis=0)
    gi = jnp.concatenate([noise, lbl], axis=1)
    h = gi @ params["w1"] + params["b1"]
    h = jnp.maximum(h, 0.2 * h)
    h = h @ params["w2"] + params["b2"]
    h = jnp.maximum(h, 0.2 * h)
    ref = jnp.tanh(h @ params["w3"] + params["b3"]).reshape(B, 1, 28, 28)
    assert bool(jnp.max(jnp.abs(img - ref)) < 5e-2), float(jnp.max(jnp.abs(img - ref)))

    print("KERNEL_OK")
</pallas_src>

<mosaic_0001>
module attributes {stable_mosaic.version = 11 : i64} {
  func.func @_generator_mlp_kernel(%arg0: i32, %arg1: memref<16x128xbf16, #tpu.memory_space<vmem>>, %arg2: memref<128x256xbf16, #tpu.memory_space<vmem>>, %arg3: memref<1x256xf32, #tpu.memory_space<vmem>>, %arg4: memref<256x512xbf16, #tpu.memory_space<vmem>>, %arg5: memref<1x512xf32, #tpu.memory_space<vmem>>, %arg6: memref<512x896xbf16, #tpu.memory_space<vmem>>, %arg7: memref<1x896xf32, #tpu.memory_space<vmem>>, %arg8: memref<16x784xf32, #tpu.memory_space<vmem>>) attributes {dimension_semantics = [#tpu.dimension_semantics<parallel>], iteration_bounds = array<i64: 1>, scalar_prefetch = 0 : i64, scratch_operands = 0 : i64, tpu.core_type = #tpu.core_type<tc>, window_params = [{transform_indices = @transform_0, window_bounds = array<i64: 16, 128>}, {pipeline_mode = #tpu.pipeline_mode<synchronous>, transform_indices = @transform_1, window_bounds = array<i64: 128, 256>}, {pipeline_mode = #tpu.pipeline_mode<synchronous>, transform_indices = @transform_2, window_bounds = array<i64: 1, 256>}, {pipeline_mode = #tpu.pipeline_mode<synchronous>, transform_indices = @transform_3, window_bounds = array<i64: 256, 512>}, {pipeline_mode = #tpu.pipeline_mode<synchronous>, transform_indices = @transform_4, window_bounds = array<i64: 1, 512>}, {pipeline_mode = #tpu.pipeline_mode<synchronous>, transform_indices = @transform_5, window_bounds = array<i64: 512, 896>}, {pipeline_mode = #tpu.pipeline_mode<synchronous>, transform_indices = @transform_6, window_bounds = array<i64: 1, 896>}, {transform_indices = @transform_7, window_bounds = array<i64: 16, 784>}]} {
    %c0 = arith.constant 0 : index
    %c0_0 = arith.constant 0 : index
    %0 = vector.load %arg1[%c0, %c0_0] : memref<16x128xbf16, #tpu.memory_space<vmem>>, vector<16x128xbf16>
    %c0_1 = arith.constant 0 : index
    %c0_2 = arith.constant 0 : index
    %1 = vector.load %arg2[%c0_1, %c0_2] : memref<128x256xbf16, #tpu.memory_space<vmem>>, vector<128x256xbf16>
    %cst = arith.constant dense<0.000000e+00> : vector<16x256xf32>
    %2 = tpu.matmul %0, %1, %cst {dimension_numbers = #tpu.dot_dimension_numbers<[1], [0], [0], [1], [0, 0, 1, 1], [], []>} : vector<16x128xbf16>, vector<128x256xbf16>, vector<16x256xf32> -> vector<16x256xf32>
    %c0_3 = arith.constant 0 : index
    %c0_4 = arith.constant 0 : index
    %3 = vector.load %arg3[%c0_3, %c0_4] : memref<1x256xf32, #tpu.memory_space<vmem>>, vector<1x256xf32>
    %4 = vector.broadcast %3 : vector<1x256xf32> to vector<16x256xf32>
    %5 = arith.addf %2, %4 : vector<16x256xf32>
    %cst_5 = arith.constant 2.000000e-01 : f32
    %6 = vector.broadcast %cst_5 : f32 to vector<16x256xf32>
    %7 = arith.mulf %6, %5 : vector<16x256xf32>
    %8 = arith.maximumf %5, %7 : vector<16x256xf32>
    %9 = arith.truncf %8 : vector<16x256xf32> to vector<16x256xbf16>
    %c0_6 = arith.constant 0 : index
    %c0_7 = arith.constant 0 : index
    %10 = vector.load %arg4[%c0_6, %c0_7] : memref<256x512xbf16, #tpu.memory_space<vmem>>, vector<256x512xbf16>
    %cst_8 = arith.constant dense<0.000000e+00> : vector<16x512xf32>
    %11 = tpu.matmul %9, %10, %cst_8 {dimension_numbers = #tpu.dot_dimension_numbers<[1], [0], [0], [1], [0, 0, 1, 1], [], []>} : vector<16x256xbf16>, vector<256x512xbf16>, vector<16x512xf32> -> vector<16x512xf32>
    %c0_9 = arith.constant 0 : index
    %c0_10 = arith.constant 0 : index
    %12 = vector.load %arg5[%c0_9, %c0_10] : memref<1x512xf32, #tpu.memory_space<vmem>>, vector<1x512xf32>
    %13 = vector.broadcast %12 : vector<1x512xf32> to vector<16x512xf32>
    %14 = arith.addf %11, %13 : vector<16x512xf32>
    %cst_11 = arith.constant 2.000000e-01 : f32
    %15 = vector.broadcast %cst_11 : f32 to vector<16x512xf32>
    %16 = arith.mulf %15, %14 : vector<16x512xf32>
    %17 = arith.maximumf %14, %16 : vector<16x512xf32>
    %18 = arith.truncf %17 : vector<16x512xf32> to vector<16x512xbf16>
    %c0_12 = arith.constant 0 : index
    %c0_13 = arith.constant 0 : index
    %19 = vector.load %arg6[%c0_12, %c0_13] : memref<512x896xbf16, #tpu.memory_space<vmem>>, vector<512x896xbf16>
    %cst_14 = arith.constant dense<0.000000e+00> : vector<16x896xf32>
    %20 = tpu.matmul %18, %19, %cst_14 {dimension_numbers = #tpu.dot_dimension_numbers<[1], [0], [0], [1], [0, 0, 1, 1], [], []>} : vector<16x512xbf16>, vector<512x896xbf16>, vector<16x896xf32> -> vector<16x896xf32>
    %c0_15 = arith.constant 0 : index
    %c0_16 = arith.constant 0 : index
    %21 = vector.load %arg7[%c0_15, %c0_16] : memref<1x896xf32, #tpu.memory_space<vmem>>, vector<1x896xf32>
    %22 = vector.broadcast %21 : vector<1x896xf32> to vector<16x896xf32>
    %23 = arith.addf %20, %22 : vector<16x896xf32>
    %24 = vector.extract_strided_slice %23 {offsets = [0, 0], sizes = [16, 784], strides = [1, 1]} : vector<16x896xf32> to vector<16x784xf32>
    %25 = math.tanh %24 : vector<16x784xf32>
    %c0_17 = arith.constant 0 : index
    %c0_18 = arith.constant 0 : index
    %26 = vector.load %arg8[%c0_17, %c0_18] : memref<16x784xf32, #tpu.memory_space<vmem>>, vector<16x784xf32>
    tpu.vector_store %arg8[%c0_17, %c0_18], %25 {strides = array<i32>} : memref<16x784xf32, #tpu.memory_space<vmem>>, vector<16x784xf32>,
    return
  }
  func.func @transform_0(%arg0: i32) -> (i32, i32) {
    %c0_i32 = arith.constant 0 : i32
    %c0_i32_0 = arith.constant 0 : i32
    return %arg0, %c0_i32 : i32, i32
  }
  func.func @transform_1(%arg0: i32) -> (i32, i32) {
    %c0_i32 = arith.constant 0 : i32
    %c0_i32_0 = arith.constant 0 : i32
    %c0_i32_1 = arith.constant 0 : i32
    return %c0_i32, %c0_i32_0 : i32, i32
  }
  func.func @transform_2(%arg0: i32) -> (i32, i32) {
    %c0_i32 = arith.constant 0 : i32
    %c0_i32_0 = arith.constant 0 : i32
    %c0_i32_1 = arith.constant 0 : i32
    return %c0_i32, %c0_i32_0 : i32, i32
  }
  func.func @transform_3(%arg0: i32) -> (i32, i32) {
    %c0_i32 = arith.constant 0 : i32
    %c0_i32_0 = arith.constant 0 : i32
    %c0_i32_1 = arith.constant 0 : i32
    return %c0_i32, %c0_i32_0 : i32, i32
  }
  func.func @transform_4(%arg0: i32) -> (i32, i32) {
    %c0_i32 = arith.constant 0 : i32
    %c0_i32_0 = arith.constant 0 : i32
    %c0_i32_1 = arith.constant 0 : i32
    return %c0_i32, %c0_i32_0 : i32, i32
  }
  func.func @transform_5(%arg0: i32) -> (i32, i32) {
    %c0_i32 = arith.constant 0 : i32
    %c0_i32_0 = arith.constant 0 : i32
    %c0_i32_1 = arith.constant 0 : i32
    return %c0_i32, %c0_i32_0 : i32, i32
  }
  func.func @transform_6(%arg0: i32) -> (i32, i32) {
    %c0_i32 = arith.constant 0 : i32
    %c0_i32_0 = arith.constant 0 : i32
    %c0_i32_1 = arith.constant 0 : i32
    return %c0_i32, %c0_i32_0 : i32, i32
  }
  func.func @transform_7(%arg0: i32) -> (i32, i32) {
    %c0_i32 = arith.constant 0 : i32
    %c0_i32_0 = arith.constant 0 : i32
    return %arg0, %c0_i32 : i32, i32
  }
}

</mosaic_0001>

<bundles_post_ra>
// kernel: tpu_custom_call.1
= control target key start
LH: loop header
LB: loop body
LE: loop exit
PB: predicated region body
PF: predicated region fallthrough
CT: control target
= control target key end

     0   :  { %12 = vsyncpa [#allocation3], 0  ;;  %s3758_s0 = inlined_call_operand.hbm [shape: bf16[16,128], index: 0, kind: input, shape index: {}]   ;;  %s3759_s1 = inlined_call_operand.hbm [shape: bf16[128,256], index: 1, kind: input, shape index: {}]   ;;  %s3760_s2 = inlined_call_operand.vmem [shape: f32[1,256], index: 2, kind: input, shape index: {}]   ;;  %s3761_s3 = inlined_call_operand.hbm [shape: bf16[256,512], index: 3, kind: input, shape index: {}]   ;;  %s3762_s4 = inlined_call_operand.vmem [shape: f32[1,512], index: 4, kind: input, shape index: {}]   ;;  %s3763_s5 = inlined_call_operand.hbm [shape: bf16[512,896], index: 5, kind: input, shape index: {}]   ;;  %s3764_s6 = inlined_call_operand.vmem [shape: f32[1,896], index: 6, kind: input, shape index: {}]   ;;  %s3765_s7 = inlined_call_operand.hbm [shape: f32[16,784], index: 7, kind: output, shape index: {}]  }
   0x1   :  { %13 = vsyncpa [#allocation6], 0 }
   0x2   :  { %14 = vsyncpa [#allocation9], 0 }
   0x3   :  { %15 = vsyncpa [#allocation4], 0  ;;  %s3573_s24 = smov [#allocation5]   ;;  %s3455_s28 = scalar_lea.hbm %s3759_s1, 2048 }
   0x4   :  { %s33_s25 = sshll.u32 %s3573_s24, 4  ;;  %p3456_p0 = scmp.ne.s32.totalorder %s3759_s1, %s3455_s28  ;;  %s34_s25 = int_to_ptr.vmem [resolvable:$true] %s33_s25 }
   0x5   :  { %p3459_p1 = scmp.lt.u32.totalorder %s3455_s28, %s3759_s1 }
   0x7   :  { %p3461_p2 = pnand %p3459_p1, %p3456_p0 }
   0x9   :  { %3464 = shalt.err (!%p3461_p2)
}
   0xa   :  { %s3465_s10 = scalar_lea.vmem %s34_s25, 2048  ;;  %p3470_p4 = scmp.lt.s32.totalorder %s34_s25, %s34_s25 }
   0xb   :  { %p3466_p3 = scmp.ne.s32.totalorder %s34_s25, %s3465_s10  ;;  %p3471_p5 = scmp.lt.s32.totalorder %s3465_s10, %s3465_s10 }
   0xd   :  { %p3472_p6 = por %p3471_p5, %p3470_p4 }
   0xf   :  { %p3473_p7 = pnand %p3472_p6, %p3466_p3 }
  0x11   :  { %3476 = shalt.err (!%p3473_p7)
}
  0x12   :  { %s3574_s11 = smov 128   ;;  %s3575_s12 = smov 8  }
  0x13   :  { %39 = dma.hbm_to_vmem [thread:$0]  %s3759_s1, 2048, %s34_s25, [#allocation6], %s3574_s11, %s3574_s11, %s3575_s12  }
  0x14   :  { %s3576_s15 = smov [#allocation2]   ;;  %s3477_s19 = scalar_lea.hbm %s3758_s0, 128 }
  0x15   :  { %s21_s16 = sshll.u32 %s3576_s15, 4  ;;  %p3478_p8 = scmp.ne.s32.totalorder %s3758_s0, %s3477_s19  ;;  %s22_s16 = int_to_ptr.vmem [resolvable:$true] %s21_s16 }
  0x16   :  { %p3481_p9 = scmp.lt.u32.totalorder %s3477_s19, %s3758_s0 }
  0x18   :  { %p3483_p10 = pnand %p3481_p9, %p3478_p8 }
  0x1a   :  { %3486 = shalt.err (!%p3483_p10)
}
  0x1b   :  { %s3487_s24 = scalar_lea.vmem %s22_s16, 128  ;;  %p3492_p12 = scmp.lt.s32.totalorder %s22_s16, %s22_s16 }
  0x1c   :  { %p3488_p11 = scmp.ne.s32.totalorder %s22_s16, %s3487_s24  ;;  %p3493_p13 = scmp.lt.s32.totalorder %s3487_s24, %s3487_s24 }
  0x1e   :  { %p3494_p0 = por %p3493_p13, %p3492_p12 }
  0x20   :  { %p3495_p1 = pnand %p3494_p0, %p3488_p11 }
  0x22   :  { %3498 = shalt.err (!%p3495_p1)
}
  0x23   :  { %s3577_s1 = smov 64   ;;  %s3578_s25 = smov 4  }
  0x24   :  { %27 = dma.hbm_to_vmem [thread:$0]  %s3758_s0, 128, %s22_s16, [#allocation3], %s3577_s1, %s3577_s1, %s3578_s25  }
  0x25   :  { %s3579_s28 = smov [#allocation7]   ;;  %s3499_s9 = scalar_lea.hbm %s3761_s3, 8192 }
  0x26   :  { %s47_s29 = sshll.u32 %s3579_s28, 4  ;;  %p3500_p2 = scmp.ne.s32.totalorder %s3761_s3, %s3499_s9  ;;  %s48_s29 = int_to_ptr.vmem [resolvable:$true] %s47_s29 }
  0x27   :  { %p3503_p3 = scmp.lt.u32.totalorder %s3499_s9, %s3761_s3 }
  0x29   :  { %p3505_p4 = pnand %p3503_p3, %p3500_p2 }
  0x2b   :  { %3508 = shalt.err (!%p3505_p4)
}
  0x2c   :  { %s3509_s14 = scalar_lea.vmem %s48_s29, 8192  ;;  %p3514_p6 = scmp.lt.s32.totalorder %s48_s29, %s48_s29 }
  0x2d   :  { %p3510_p5 = scmp.ne.s32.totalorder %s48_s29, %s3509_s14  ;;  %p3515_p7 = scmp.lt.s32.totalorder %s3509_s14, %s3509_s14 }
  0x2f   :  { %p3516_p8 = por %p3515_p7, %p3514_p6 }
  0x31   :  { %p3517_p9 = pnand %p3516_p8, %p3510_p5 }
  0x33   :  { %3520 = shalt.err (!%p3517_p9)
}
  0x34   :  { %s3580_s0 = smov 256   ;;  %s3581_s15 = smov 16  }
  0x35   :  { %53 = dma.hbm_to_vmem [thread:$0]  %s3761_s3, 8192, %s48_s29, [#allocation6], %s3580_s0, %s3580_s0, %s3581_s15  }
  0x36   :  { %s3582_s18 = smov [#allocation8]   ;;  %s3521_s22 = scalar_lea.hbm %s3763_s5, 28672 }
  0x37   :  { %s61_s19 = sshll.u32 %s3582_s18, 4  ;;  %p3522_p10 = scmp.ne.s32.totalorder %s3763_s5, %s3521_s22  ;;  %s62_s19 = int_to_ptr.vmem [resolvable:$true] %s61_s19 }
  0x38   :  { %p3525_p11 = scmp.lt.u32.totalorder %s3521_s22, %s3763_s5 }
  0x3a   :  { %p3527_p12 = pnand %p3525_p11, %p3522_p10 }
  0x3c   :  { %3530 = shalt.err (!%p3527_p12)
}
  0x3d   :  { %s3531_s26 = scalar_lea.vmem %s62_s19, 28672  ;;  %p3536_p0 = scmp.lt.s32.totalorder %s62_s19, %s62_s19 }
  0x3e   :  { %p3532_p13 = scmp.ne.s32.totalorder %s62_s19, %s3531_s26  ;;  %p3537_p1 = scmp.lt.s32.totalorder %s3531_s26, %s3531_s26 }
  0x40   :  { %p3538_p2 = por %p3537_p1, %p3536_p0 }
  0x42   :  { %p3539_p3 = pnand %p3538_p2, %p3532_p13 }
  0x44   :  { %3542 = shalt.err (!%p3539_p3)
}
  0x45   :  { %s3583_s3 = smov 448   ;;  %s3584_s27 = smov 28  }
  0x46   :  { %67 = dma.hbm_to_vmem [thread:$0]  %s3763_s5, 28672, %s62_s19, [#allocation9], %s3583_s3, %s3583_s3, %s3584_s27  }
  0x47   :  { %3565 = dma.done.wait [#allocation3], 128  }
  0x48   :  { %3566 = vsyncadd [#allocation3], 4294967168 }
  0x49   :  { %3567 = dma.done.wait [#allocation6], 10240  }
  0x4a   :  { %3568 = vsyncadd [#allocation6], 4294957056 }
  0x4b   :  { %3569 = dma.done.wait [#allocation9], 28672  }
  0x4c   :  { %3570 = vsyncadd [#allocation9], 4294938624  ;;  %v3585_v0 = vmov 0   ;;  %v2986_v1 = vld [vmem:[#allocation5 + $0x4] ss:$8 sps:$4 sm:$0xff]   ;;  %v3010_v29 = vld [vmem:[#allocation2] sm:$0xff]  }
  0x4d   :  { %231 = vmatprep.mubr.bf16.mxu0 %v3585_v0  ;;  %v2988_v2 = vld [vmem:[#allocation5] ss:$8 sps:$4 sm:$0xff]   ;;  %199 = vmatprep.subr.bf16.mxu0 %v2986_v1  ;;  %v2989_v3 = vld [vmem:[#allocation5 + $0x14] ss:$8 sps:$4 sm:$0xff]   ;;  %v2991_v4 = vld [vmem:[#allocation5 + $0x10] ss:$8 sps:$4 sm:$0xff]  }
  0x4e   :  { %200 = vmatpush1.bf16.msra.mxu0 %v2988_v2  ;;  %v2992_v5 = vld [vmem:[#allocation5 + $0x24] ss:$8 sps:$4 sm:$0xff]   ;;  %v2994_v6 = vld [vmem:[#allocation5 + $0x20] ss:$8 sps:$4 sm:$0xff]   ;;  %v2995_v7 = vld [vmem:[#allocation5 + $0x34] ss:$8 sps:$4 sm:$0xff]  }
  0x4f   :  { %201 = vmatprep.subr.bf16.mxu0 %v2989_v3  ;;  %v2997_v8 = vld [vmem:[#allocation5 + $0x30] ss:$8 sps:$4 sm:$0xff]   ;;  %v2998_v9 = vld [vmem:[#allocation5 + $0x44] ss:$8 sps:$4 sm:$0xff]   ;;  %v3000_v11 = vld [vmem:[#allocation5 + $0x40] ss:$8 sps:$4 sm:$0xff]  }
  0x50   :  { %v3011_v10 = vld [vmem:[#allocation7 + $0x4] ss:$16 sps:$4 sm:$0xff]   ;;  %v3016_v12 = vld [vmem:[#allocation7] ss:$16 sps:$4 sm:$0xff]   ;;  %v3015_v26 = vld [vmem:[#allocation7 + $0xc] ss:$16 sps:$4 sm:$0xff]  }
  0x51   :  { %658 = vmatprep.subr.bf16.mxu1 %v3011_v10  ;;  %v3017_v13 = vld [vmem:[#allocation7 + $0x24] ss:$16 sps:$4 sm:$0xff]   ;;  %v3022_v15 = vld [vmem:[#allocation7 + $0x20] ss:$16 sps:$4 sm:$0xff]   ;;  %v3013_v30 = vld [vmem:[#allocation7 + $0x8] ss:$16 sps:$4 sm:$0xff]  }
  0x52   :  { %202 = vmatpush1.bf16.msra.mxu0 %v2991_v4  ;;  %v3001_v14 = vld [vmem:[#allocation5 + $0x54] ss:$8 sps:$4 sm:$0xff]   ;;  %659 = vmatpush1.bf16.msra.mxu1 %v3016_v12  ;;  %v3003_v17 = vld [vmem:[#allocation5 + $0x50] ss:$8 sps:$4 sm:$0xff]   ;;  %v3004_v18 = vld [vmem:[#allocation5 + $0x64] ss:$8 sps:$4 sm:$0xff]  }
  0x53   :  { %203 = vmatprep.subr.bf16.mxu0 %v2992_v5  ;;  %660 = vmatprep.subr.bf16.mxu1 %v3017_v13  ;;  %v3023_v16 = vld [vmem:[#allocation7 + $0x44] ss:$16 sps:$4 sm:$0xff]   ;;  %v3028_v19 = vld [vmem:[#allocation7 + $0x40] ss:$16 sps:$4 sm:$0xff]   ;;  %v3021_v31 = vld [vmem:[#allocation7 + $0x2c] ss:$16 sps:$4 sm:$0xff]  }
  0x54   :  { %v3029_v20 = vld [vmem:[#allocation7 + $0x64] ss:$16 sps:$4 sm:$0xff]   ;;  %v3006_v21 = vld [vmem:[#allocation5 + $0x60] ss:$8 sps:$4 sm:$0xff]   ;;  %v3009_v25 = vld [vmem:[#allocation5 + $0x70] ss:$8 sps:$4 sm:$0xff]  }
  0x55   :  { %v3007_v22 = vld [vmem:[#allocation5 + $0x74] ss:$8 sps:$4 sm:$0xff]   ;;  %v3034_v23 = vld [vmem:[#allocation7 + $0x60] ss:$16 sps:$4 sm:$0xff]   ;;  %v3019_v34 = vld [vmem:[#allocation7 + $0x28] ss:$16 sps:$4 sm:$0xff]  }
  0x56   :  { %204 = vmatpush1.bf16.msra.mxu0 %v2994_v6  ;;  %661 = vmatpush1.bf16.msra.mxu1 %v3022_v15  ;;  %v3035_v24 = vld [vmem:[#allocation7 + $0x84] ss:$16 sps:$4 sm:$0xff]   ;;  %v3040_v27 = vld [vmem:[#allocation7 + $0x80] ss:$16 sps:$4 sm:$0xff]   ;;  %v3027_v35 = vld [vmem:[#allocation7 + $0x4c] ss:$16 sps:$4 sm:$0xff]  }
  0x57   :  { %205 = vmatprep.subr.bf16.mxu0 %v2995_v7  ;;  %662 = vmatprep.subr.bf16.mxu1 %v3023_v16  ;;  %v3041_v28 = vld [vmem:[#allocation7 + $0xa4] ss:$16 sps:$4 sm:$0xff]   ;;  %v3046_v32 = vld [vmem:[#allocation7 + $0xa0] ss:$16 sps:$4 sm:$0xff]   ;;  %v3025_v38 = vld [vmem:[#allocation7 + $0x48] ss:$16 sps:$4 sm:$0xff]  }
  0x58   :  { %v3047_v33 = vld [vmem:[#allocation7 + $0xc4] ss:$16 sps:$4 sm:$0xff]   ;;  %v3052_v36 = vld [vmem:[#allocation7 + $0xc0] ss:$16 sps:$4 sm:$0xff]   ;;  %v3033_v39 = vld [vmem:[#allocation7 + $0x6c] ss:$16 sps:$4 sm:$0xff]  }
  0x59   :  { %v3053_v37 = vld [vmem:[#allocation7 + $0xe4] ss:$16 sps:$4 sm:$0xff]   ;;  %v3058_v40 = vld [vmem:[#allocation7 + $0xe0] ss:$16 sps:$4 sm:$0xff]   ;;  %v3031_v42 = vld [vmem:[#allocation7 + $0x68] ss:$16 sps:$4 sm:$0xff]  }
  0x5a   :  { %206 = vmatpush1.bf16.msra.mxu0 %v2997_v8  ;;  %663 = vmatpush1.bf16.msra.mxu1 %v3028_v19  ;;  %v3059_v41 = vld [vmem:[#allocation7 + $0x104] ss:$16 sps:$4 sm:$0xff]   ;;  %v3039_v43 = vld [vmem:[#allocation7 + $0x8c] ss:$16 sps:$4 sm:$0xff]   ;;  %v3064_v44 = vld [vmem:[#allocation7 + $0x100] ss:$16 sps:$4 sm:$0xff]  }
  0x5b   :  { %207 = vmatprep.subr.bf16.mxu0 %v2998_v9  ;;  %664 = vmatprep.subr.bf16.mxu1 %v3029_v20  ;;  %v3037_v45 = vld [vmem:[#allocation7 + $0x88] ss:$16 sps:$4 sm:$0xff]   ;;  %v3065_v46 = vld [vmem:[#allocation7 + $0x124] ss:$16 sps:$4 sm:$0xff]   ;;  %v3045_v47 = vld [vmem:[#allocation7 + $0xac] ss:$16 sps:$4 sm:$0xff]   ;;  %v103_v20 = vlaneseq }
  0x5c   :  { %v3070_v48 = vld [vmem:[#allocation7 + $0x120] ss:$16 sps:$4 sm:$0xff]   ;;  %v3071_v49 = vld [vmem:[#allocation7 + $0x144] ss:$16 sps:$4 sm:$0xff]   ;;  %v3043_v50 = vld [vmem:[#allocation7 + $0xa8] ss:$16 sps:$4 sm:$0xff]  }
  0x5d   :  { %v3051_v51 = vld [vmem:[#allocation7 + $0xcc] ss:$16 sps:$4 sm:$0xff]   ;;  %v3076_v52 = vld [vmem:[#allocation7 + $0x140] ss:$16 sps:$4 sm:$0xff]   ;;  %v3077_v53 = vld [vmem:[#allocation7 + $0x164] ss:$16 sps:$4 sm:$0xff]  }
  0x5e   :  { %208 = vmatpush1.bf16.msra.mxu0 %v3000_v11  ;;  %665 = vmatpush1.bf16.msra.mxu1 %v3034_v23  ;;  %v3049_v54 = vld [vmem:[#allocation7 + $0xc8] ss:$16 sps:$4 sm:$0xff]   ;;  %v3057_v55 = vld [vmem:[#allocation7 + $0xec] ss:$16 sps:$4 sm:$0xff]   ;;  %v3082_v56 = vld [vmem:[#allocation7 + $0x160] ss:$16 sps:$4 sm:$0xff]  }
  0x5f   :  { %209 = vmatprep.subr.bf16.mxu0 %v3001_v14  ;;  %666 = vmatprep.subr.bf16.mxu1 %v3035_v24  ;;  %v3083_v57 = vld [vmem:[#allocation7 + $0x184] ss:$16 sps:$4 sm:$0xff]   ;;  %v3055_v58 = vld [vmem:[#allocation7 + $0xe8] ss:$16 sps:$4 sm:$0xff]   ;;  %v3063_v59 = vld [vmem:[#allocation7 + $0x10c] ss:$16 sps:$4 sm:$0xff]  }
  0x60   :  { %v3088_v60 = vld [vmem:[#allocation7 + $0x180] ss:$16 sps:$4 sm:$0xff]   ;;  %v3061_v61 = vld [vmem:[#allocation7 + $0x108] ss:$16 sps:$4 sm:$0xff]   ;;  %v3069_v62 = vld [vmem:[#allocation7 + $0x12c] ss:$16 sps:$4 sm:$0xff]  }
  0x61   :  { %v3067_v63 = vld [vmem:[#allocation7 + $0x128] ss:$16 sps:$4 sm:$0xff]   ;;  %v3075_v0 = vld [vmem:[#allocation7 + $0x14c] ss:$16 sps:$4 sm:$0xff]   ;;  %v3089_v6 = vld [vmem:[#allocation7 + $0x1a4] ss:$16 sps:$4 sm:$0xff]  }
  0x62   :  { %210 = vmatpush1.bf16.msra.mxu0 %v3003_v17  ;;  %667 = vmatpush1.bf16.msra.mxu1 %v3040_v27  ;;  %v3073_v1 = vld [vmem:[#allocation7 + $0x148] ss:$16 sps:$4 sm:$0xff]   ;;  %v3081_v2 = vld [vmem:[#allocation7 + $0x16c] ss:$16 sps:$4 sm:$0xff]   ;;  %v3094_v9 = vld [vmem:[#allocation7 + $0x1a0] ss:$16 sps:$4 sm:$0xff]  }
  0x63   :  { %211 = vmatprep.subr.bf16.mxu0 %v3004_v18  ;;  %668 = vmatprep.subr.bf16.mxu1 %v3041_v28  ;;  %v3079_v3 = vld [vmem:[#allocation7 + $0x168] ss:$16 sps:$4 sm:$0xff]   ;;  %v3087_v4 = vld [vmem:[#allocation7 + $0x18c] ss:$16 sps:$4 sm:$0xff]   ;;  %v3095_v10 = vld [vmem:[#allocation7 + $0x1c4] ss:$16 sps:$4 sm:$0xff]  }
  0x64   :  { %v3085_v5 = vld [vmem:[#allocation7 + $0x188] ss:$16 sps:$4 sm:$0xff]   ;;  %v3093_v7 = vld [vmem:[#allocation7 + $0x1ac] ss:$16 sps:$4 sm:$0xff]   ;;  %v3100_v13 = vld [vmem:[#allocation7 + $0x1c0] ss:$16 sps:$4 sm:$0xff]  }
  0x65   :  { %v3091_v8 = vld [vmem:[#allocation7 + $0x1a8] ss:$16 sps:$4 sm:$0xff]   ;;  %v3099_v11 = vld [vmem:[#allocation7 + $0x1cc] ss:$16 sps:$4 sm:$0xff]   ;;  %v3101_v14 = vld [vmem:[#allocation7 + $0x1e4] ss:$16 sps:$4 sm:$0xff]  }
  0x66   :  { %212 = vmatpush1.bf16.msra.mxu0 %v3006_v21  ;;  %669 = vmatpush1.bf16.msra.mxu1 %v3046_v32  ;;  %v3097_v12 = vld [vmem:[#allocation7 + $0x1c8] ss:$16 sps:$4 sm:$0xff]   ;;  %v3105_v15 = vld [vmem:[#allocation7 + $0x1ec] ss:$16 sps:$4 sm:$0xff]   ;;  %v3106_v17 = vld [vmem:[#allocation7 + $0x1e0] ss:$16 sps:$4 sm:$0xff]  }
  0x67   :  { %213 = vmatprep.subr.bf16.mxu0 %v3007_v22  ;;  %670 = vmatprep.subr.bf16.mxu1 %v3047_v33  ;;  %v3103_v16 = vld [vmem:[#allocation7 + $0x1e8] ss:$16 sps:$4 sm:$0xff]   ;;  %v3109_v18 = vld [vmem:[#allocation8 + $0x4] ss:$28 sps:$4 sm:$0xff]   ;;  %v3677_v21 = vshrl.u32 %v103_v20, 7  ;;  %vm2569_vm0 = vcmask 130048  }
  0x68   :  { %v3112_v19 = vld [vmem:[#allocation8 + $0xc] ss:$28 sps:$4 sm:$0xff]   ;;  %v101_v23 = vld [vmem:[%s3760_s2] sm:$0x3] }
  0x69   :  { %v3680_v22 = vsub.s32 0, %v3677_v21  ;;  %v3686_v24 = vsub.s32 1, %v3677_v21  ;;  %v3172_v20 = vld [vmem:[#allocation8 + $0x23c] ss:$28 sps:$4 sm:$0xff]  }
  0x6a   :  { %214 = vmatpush1.bf16.msra.mxu0 %v3009_v25  ;;  %671 = vmatpush1.bf16.msra.mxu1 %v3052_v36 }
  0x6b   :  { %701 = vmatprep.subr.bf16.mxu0 %v3015_v26  ;;  %672 = vmatprep.subr.bf16.mxu1 %v3053_v37  ;;  %v106_v25 = vrot.slane %v101_v23, %v3680_v22  ;;  %v110_v26 = vrot.slane %v101_v23, %v3686_v24  ;;  %v3167_v23 = vld [vmem:[#allocation8 + $0x230] ss:$28 sps:$4 sm:$0xff]  }
  0x6d   :  { %232 = vmatmul.mubr.bf16.vlgmr.msra.gmra.mrb[0].mxu0 %v3010_v29 }
  0x6e   :  { %702 = vmatpush1.bf16.msra.mxu0 %v3013_v30  ;;  %673 = vmatpush1.bf16.msra.mxu1 %v3058_v40 }
  0x6f   :  { %703 = vmatprep.subr.bf16.mxu0 %v3021_v31  ;;  %674 = vmatprep.subr.bf16.mxu1 %v3059_v41 }
  0x72   :  { %704 = vmatpush1.bf16.msra.mxu0 %v3019_v34  ;;  %675 = vmatpush1.bf16.msra.mxu1 %v3064_v44 }
  0x73   :  { %705 = vmatprep.subr.bf16.mxu0 %v3027_v35  ;;  %676 = vmatprep.subr.bf16.mxu1 %v3065_v46  ;;  %v3110_v46 = vld [vmem:[#allocation8 + $0x8] ss:$28 sps:$4 sm:$0xff]  }
  0x76   :  { %706 = vmatpush1.bf16.msra.mxu0 %v3025_v38  ;;  %677 = vmatpush1.bf16.msra.mxu1 %v3070_v48  ;;  %v3118_v48 = vld [vmem:[#allocation8 + $0x44] ss:$28 sps:$4 sm:$0xff]  }
  0x77   :  { %707 = vmatprep.subr.bf16.mxu0 %v3033_v39  ;;  %678 = vmatprep.subr.bf16.mxu1 %v3071_v49  ;;  %v3113_v49 = vld [vmem:[#allocation8 + $0x38] ss:$28 sps:$4 sm:$0xff]  }
  0x7a   :  { %708 = vmatpush1.bf16.msra.mxu0 %v3031_v42  ;;  %679 = vmatpush1.bf16.msra.mxu1 %v3076_v52  ;;  %v3124_v52 = vld [vmem:[#allocation8 + $0x7c] ss:$28 sps:$4 sm:$0xff]  }
  0x7b   :  { %709 = vmatprep.subr.bf16.mxu0 %v3039_v43  ;;  %680 = vmatprep.subr.bf16.mxu1 %v3077_v53  ;;  %v3119_v53 = vld [vmem:[#allocation8 + $0x70] ss:$28 sps:$4 sm:$0xff]  }
  0x7e   :  { %710 = vmatpush1.bf16.msra.mxu0 %v3037_v45  ;;  %681 = vmatpush1.bf16.msra.mxu1 %v3082_v56  ;;  %v3107_v45 = vld [vmem:[#allocation8] ss:$28 sps:$4 sm:$0xff]   ;;  %v3130_v56 = vld [vmem:[#allocation8 + $0xb4] ss:$28 sps:$4 sm:$0xff]  }
  0x7f   :  { %711 = vmatprep.subr.bf16.mxu0 %v3045_v47  ;;  %682 = vmatprep.subr.bf16.mxu1 %v3083_v57  ;;  %v3115_v47 = vld [vmem:[#allocation8 + $0x3c] ss:$28 sps:$4 sm:$0xff]   ;;  %v3125_v57 = vld [vmem:[#allocation8 + $0xa8] ss:$28 sps:$4 sm:$0xff]  }
  0x82   :  { %712 = vmatpush1.bf16.msra.mxu0 %v3043_v50  ;;  %683 = vmatpush1.bf16.msra.mxu1 %v3088_v60  ;;  %v3116_v50 = vld [vmem:[#allocation8 + $0x40] ss:$28 sps:$4 sm:$0xff]   ;;  %v3136_v60 = vld [vmem:[#allocation8 + $0xec] ss:$28 sps:$4 sm:$0xff]  }
  0x83   :  { %713 = vmatprep.subr.bf16.mxu0 %v3051_v51  ;;  %684 = vmatprep.subr.bf16.mxu1 %v3089_v6  ;;  %v3121_v51 = vld [vmem:[#allocation8 + $0x74] ss:$28 sps:$4 sm:$0xff]  }
  0x84   :  { %v3146_v6 = vld [vmem:[#allocation8 + $0x158] ss:$28 sps:$4 sm:$0xff]  }
  0x86   :  { %714 = vmatpush1.bf16.msra.mxu0 %v3049_v54  ;;  %685 = vmatpush1.bf16.msra.mxu1 %v3094_v9  ;;  %v3122_v54 = vld [vmem:[#allocation8 + $0x78] ss:$28 sps:$4 sm:$0xff]   ;;  %v3149_v9 = vld [vmem:[#allocation8 + $0x188] ss:$28 sps:$4 sm:$0xff]  }
  0x87   :  { %715 = vmatprep.subr.bf16.mxu0 %v3057_v55  ;;  %686 = vmatprep.subr.bf16.mxu1 %v3095_v10  ;;  %v3127_v55 = vld [vmem:[#allocation8 + $0xac] ss:$28 sps:$4 sm:$0xff]  }
  0x88   :  { %v3152_v10 = vld [vmem:[#allocation8 + $0x190] ss:$28 sps:$4 sm:$0xff]  }
  0x8a   :  { %716 = vmatpush1.bf16.msra.mxu0 %v3055_v58  ;;  %687 = vmatpush1.bf16.msra.mxu1 %v3100_v13  ;;  %v3128_v58 = vld [vmem:[#allocation8 + $0xb0] ss:$28 sps:$4 sm:$0xff]   ;;  %v3155_v13 = vld [vmem:[#allocation8 + $0x1c0] ss:$28 sps:$4 sm:$0xff]  }
  0x8b   :  { %717 = vmatprep.subr.bf16.mxu0 %v3063_v59  ;;  %688 = vmatprep.subr.bf16.mxu1 %v3101_v14  ;;  %v3133_v59 = vld [vmem:[#allocation8 + $0xe4] ss:$28 sps:$4 sm:$0xff]  }
  0x8c   :  { %v3158_v14 = vld [vmem:[#allocation8 + $0x1c8] ss:$28 sps:$4 sm:$0xff]  }
  0x8e   :  { %718 = vmatpush1.bf16.msra.mxu0 %v3061_v61  ;;  %689 = vmatpush1.bf16.msra.mxu1 %v3106_v17  ;;  %v3131_v61 = vld [vmem:[#allocation8 + $0xe0] ss:$28 sps:$4 sm:$0xff]   ;;  %v3161_v17 = vld [vmem:[#allocation8 + $0x1f8] ss:$28 sps:$4 sm:$0xff]  }
  0x8f   :  { %719 = vmatprep.subr.bf16.mxu0 %v3069_v62  ;;  %2209 = vmatprep.subr.bf16.mxu1 %v3109_v18  ;;  %v3134_v62 = vld [vmem:[#allocation8 + $0xe8] ss:$28 sps:$4 sm:$0xff]   ;;  %v3164_v18 = vld [vmem:[#allocation8 + $0x200] ss:$28 sps:$4 sm:$0xff]  }
  0x92   :  { %720 = vmatpush1.bf16.msra.mxu0 %v3067_v63  ;;  %v3139_v63 = vld [vmem:[#allocation8 + $0x11c] ss:$28 sps:$4 sm:$0xff]  }
  0x93   :  { %721 = vmatprep.subr.bf16.mxu0 %v3075_v0  ;;  %v3142_v0 = vld [vmem:[#allocation8 + $0x124] ss:$28 sps:$4 sm:$0xff]  }
  0x96   :  { %722 = vmatpush1.bf16.msra.mxu0 %v3073_v1  ;;  %v3137_v1 = vld [vmem:[#allocation8 + $0x118] ss:$28 sps:$4 sm:$0xff]  }
  0x97   :  { %723 = vmatprep.subr.bf16.mxu0 %v3081_v2  ;;  %v3140_v2 = vld [vmem:[#allocation8 + $0x120] ss:$28 sps:$4 sm:$0xff]  }
  0x9a   :  { %724 = vmatpush1.bf16.msra.mxu0 %v3079_v3  ;;  %v3145_v3 = vld [vmem:[#allocation8 + $0x154] ss:$28 sps:$4 sm:$0xff]  }
  0x9b   :  { %725 = vmatprep.subr.bf16.mxu0 %v3087_v4  ;;  %v3148_v4 = vld [vmem:[#allocation8 + $0x15c] ss:$28 sps:$4 sm:$0xff]  }
  0x9e   :  { %726 = vmatpush1.bf16.msra.mxu0 %v3085_v5  ;;  %v3143_v5 = vld [vmem:[#allocation8 + $0x150] ss:$28 sps:$4 sm:$0xff]  }
  0x9f   :  { %727 = vmatprep.subr.bf16.mxu0 %v3093_v7  ;;  %v3151_v7 = vld [vmem:[#allocation8 + $0x18c] ss:$28 sps:$4 sm:$0xff]  }
  0xa2   :  { %728 = vmatpush1.bf16.msra.mxu0 %v3091_v8  ;;  %v3154_v8 = vld [vmem:[#allocation8 + $0x194] ss:$28 sps:$4 sm:$0xff]  }
  0xa3   :  { %729 = vmatprep.subr.bf16.mxu0 %v3099_v11  ;;  %v3157_v11 = vld [vmem:[#allocation8 + $0x1c4] ss:$28 sps:$4 sm:$0xff]  }
  0xa6   :  { %730 = vmatpush1.bf16.msra.mxu0 %v3097_v12  ;;  %v3160_v12 = vld [vmem:[#allocation8 + $0x1cc] ss:$28 sps:$4 sm:$0xff]  }
  0xa7   :  { %731 = vmatprep.subr.bf16.mxu0 %v3105_v15  ;;  %v3163_v15 = vld [vmem:[#allocation8 + $0x1fc] ss:$28 sps:$4 sm:$0xff]  }
  0xaa   :  { %732 = vmatpush1.bf16.msra.mxu0 %v3103_v16  ;;  %v3166_v16 = vld [vmem:[#allocation8 + $0x204] ss:$28 sps:$4 sm:$0xff]  }
  0xab   :  { %2295 = vmatprep.subr.bf16.mxu0 %v3112_v19  ;;  %v3169_v19 = vld [vmem:[#allocation8 + $0x234] ss:$28 sps:$4 sm:$0xff]  }
 0x140   :  { %v233_v27 = vpop.f32.mrb[0].mxu0 }
 0x141   :  { %v234_v28 = vadd.f32 %v233_v27, %v106_v25  ;;  %v235_v29 = vpop.f32.mrb[1].mxu0  ;;  %v3178_v27 = vld [vmem:[#allocation8 + $0x274] ss:$28 sps:$4 sm:$0xff]  }
 0x142   :  { %v236_v30 = vadd.f32 %v235_v29, %v110_v26  ;;  %v237_v31 = vpop.f32.mrb[2].mxu0  ;;  %v3176_v29 = vld [vmem:[#allocation8 + $0x270] ss:$28 sps:$4 sm:$0xff]  }
 0x143   :  { %v242_v32 = vmul.f32 0.2, %v234_v28  ;;  %v238_v33 = vadd.f32 %v237_v31, %v106_v25  ;;  %v239_v34 = vpop.f32.mrb[3].mxu0  ;;  %v3170_v25 = vld [vmem:[#allocation8 + $0x238] ss:$28 sps:$4 sm:$0xff]  }
 0x144   :  { %v243_v35 = vmul.f32 0.2, %v236_v30  ;;  %v240_v36 = vadd.f32 %v239_v34, %v110_v26  ;;  %v3175_v26 = vld [vmem:[#allocation8 + $0x26c] ss:$28 sps:$4 sm:$0xff]   ;;  %v3187_v34 = vld [vmem:[#allocation8 + $0x2dc] ss:$28 sps:$4 sm:$0xff]  }
 0x145   :  { %v244_v37 = vmul.f32 0.2, %v238_v33  ;;  %v246_v39 = vmax.f32 %v234_v28, %v242_v32  ;;  %v3173_v28 = vld [vmem:[#allocation8 + $0x268] ss:$28 sps:$4 sm:$0xff]   ;;  %v3179_v32 = vld [vmem:[#allocation8 + $0x2a0] ss:$28 sps:$4 sm:$0xff]  }
 0x146   :  { %v245_v38 = vmul.f32 0.2, %v240_v36  ;;  %v247_v41 = vmax.f32 %v236_v30, %v243_v35  ;;  %v3181_v30 = vld [vmem:[#allocation8 + $0x2a4] ss:$28 sps:$4 sm:$0xff]   ;;  %v3184_v31 = vld [vmem:[#allocation8 + $0x2ac] ss:$28 sps:$4 sm:$0xff]  }
 0x147   :  { %v248_v40 = vmax.f32 %v238_v33, %v244_v37  ;;  %v3182_v33 = vld [vmem:[#allocation8 + $0x2a8] ss:$28 sps:$4 sm:$0xff]   ;;  %v3188_v37 = vld [vmem:[#allocation8 + $0x2e0] ss:$28 sps:$4 sm:$0xff]  }
 0x148   :  { %v249_v42 = vmax.f32 %v240_v36, %v245_v38  ;;  %v3190_v35 = vld [vmem:[#allocation8 + $0x2e4] ss:$28 sps:$4 sm:$0xff]   ;;  %v3185_v36 = vld [vmem:[#allocation8 + $0x2d8] ss:$28 sps:$4 sm:$0xff]  }
 0x149   :  { %v250_v43 = vpack.c.bf16 %v248_v40, %v246_v39  ;;  %v3193_v38 = vld [vmem:[#allocation8 + $0x314] ss:$28 sps:$4 sm:$0xff]   ;;  %v3196_v39 = vld [vmem:[#allocation8 + $0x31c] ss:$28 sps:$4 sm:$0xff]  }
 0x14a   :  { %v251_v44 = vpack.c.bf16 %v249_v42, %v247_v41  ;;  %v3191_v40 = vld [vmem:[#allocation8 + $0x310] ss:$28 sps:$4 sm:$0xff]   ;;  %v3194_v41 = vld [vmem:[#allocation8 + $0x318] ss:$28 sps:$4 sm:$0xff]  }
 0x14b   :  { %v3199_v42 = vld [vmem:[#allocation8 + $0x34c] ss:$28 sps:$4 sm:$0xff]  }
 0x14c   :  { %690 = vmatprep.mubr.bf16.mxu1 %v251_v44  ;;  %733 = vmatprep.mubr.bf16.mxu0 %v251_v44  ;;  %v3197_v44 = vld [vmem:[#allocation8 + $0x348] ss:$28 sps:$4 sm:$0xff]  }
 0x14d   :  { %691 = vmatmul.mubr.bf16.vlgmr.msra.gmra.mrb[0].mxu1 %v250_v43  ;;  %734 = vmatmul.mubr.bf16.vlgmr.msra.gmra.mrb[4].mxu0 %v250_v43  ;;  %v3202_v43 = vld [vmem:[#allocation8 + $0x354] ss:$28 sps:$4 sm:$0xff]  }
 0x14e   :  { %2210 = vmatpush1.bf16.msra.mxu1 %v3107_v45  ;;  %2296 = vmatpush1.bf16.msra.mxu0 %v3110_v46  ;;  %v3200_v45 = vld [vmem:[#allocation8 + $0x350] ss:$28 sps:$4 sm:$0xff]   ;;  %v3205_v46 = vld [vmem:[#allocation8 + $0x384] ss:$28 sps:$4 sm:$0xff]  }
 0x14f   :  { %2211 = vmatprep.subr.bf16.mxu1 %v3115_v47  ;;  %2297 = vmatprep.subr.bf16.mxu0 %v3118_v48  ;;  %v3208_v47 = vld [vmem:[#allocation8 + $0x38c] ss:$28 sps:$4 sm:$0xff]   ;;  %v328_v48 = vsub.s32 2, %v3677_v21 }
 0x152   :  { %2212 = vmatpush1.bf16.msra.mxu1 %v3113_v49  ;;  %2298 = vmatpush1.bf16.msra.mxu0 %v3116_v50  ;;  %v316_v49 = vld [vmem:[%s3762_s4] sm:$0xf]  ;;  %v332_v50 = vsub.s32 3, %v3677_v21 }
 0x153   :  { %2213 = vmatprep.subr.bf16.mxu1 %v3121_v51  ;;  %2299 = vmatprep.subr.bf16.mxu0 %v3124_v52  ;;  %v321_v51 = vrot.slane %v316_v49, %v3680_v22  ;;  %v329_v52 = vrot.slane %v316_v49, %v328_v48 }
 0x156   :  { %2214 = vmatpush1.bf16.msra.mxu1 %v3119_v53  ;;  %2300 = vmatpush1.bf16.msra.mxu0 %v3122_v54  ;;  %v325_v53 = vrot.slane %v316_v49, %v3686_v24  ;;  %v333_v54 = vrot.slane %v316_v49, %v332_v50  ;;  %v3235_v49 = vld [vmem:[#allocation8 + $0x49c] ss:$28 sps:$4 sm:$0xff]  }
 0x157   :  { %2215 = vmatprep.subr.bf16.mxu1 %v3127_v55  ;;  %2301 = vmatprep.subr.bf16.mxu0 %v3130_v56 }
 0x15a   :  { %2216 = vmatpush1.bf16.msra.mxu1 %v3125_v57  ;;  %2302 = vmatpush1.bf16.msra.mxu0 %v3128_v58 }
 0x15b   :  { %2217 = vmatprep.subr.bf16.mxu1 %v3133_v59  ;;  %2303 = vmatprep.subr.bf16.mxu0 %v3136_v60 }
 0x15e   :  { %2218 = vmatpush1.bf16.msra.mxu1 %v3131_v61  ;;  %2304 = vmatpush1.bf16.msra.mxu0 %v3134_v62 }
 0x15f   :  { %2219 = vmatprep.subr.bf16.mxu1 %v3139_v63  ;;  %2305 = vmatprep.subr.bf16.mxu0 %v3142_v0 }
 0x162   :  { %2220 = vmatpush1.bf16.msra.mxu1 %v3137_v1  ;;  %2306 = vmatpush1.bf16.msra.mxu0 %v3140_v2 }
 0x163   :  { %2221 = vmatprep.subr.bf16.mxu1 %v3145_v3  ;;  %2307 = vmatprep.subr.bf16.mxu0 %v3148_v4 }
 0x166   :  { %2222 = vmatpush1.bf16.msra.mxu1 %v3143_v5  ;;  %2308 = vmatpush1.bf16.msra.mxu0 %v3146_v6 }
 0x167   :  { %2223 = vmatprep.subr.bf16.mxu1 %v3151_v7  ;;  %2309 = vmatprep.subr.bf16.mxu0 %v3154_v8 }
 0x16a   :  { %2224 = vmatpush1.bf16.msra.mxu1 %v3149_v9  ;;  %2310 = vmatpush1.bf16.msra.mxu0 %v3152_v10 }
 0x16b   :  { %2225 = vmatprep.subr.bf16.mxu1 %v3157_v11  ;;  %2311 = vmatprep.subr.bf16.mxu0 %v3160_v12 }
 0x16e   :  { %2226 = vmatpush1.bf16.msra.mxu1 %v3155_v13  ;;  %2312 = vmatpush1.bf16.msra.mxu0 %v3158_v14 }
 0x16f   :  { %2227 = vmatprep.subr.bf16.mxu1 %v3163_v15  ;;  %2313 = vmatprep.subr.bf16.mxu0 %v3166_v16 }
 0x172   :  { %2228 = vmatpush1.bf16.msra.mxu1 %v3161_v17  ;;  %2314 = vmatpush1.bf16.msra.mxu0 %v3164_v18 }
 0x173   :  { %2229 = vmatprep.subr.bf16.mxu1 %v3169_v19  ;;  %2315 = vmatprep.subr.bf16.mxu0 %v3172_v20 }
 0x176   :  { %2230 = vmatpush1.bf16.msra.mxu1 %v3167_v23  ;;  %2316 = vmatpush1.bf16.msra.mxu0 %v3170_v25 }
 0x177   :  { %2231 = vmatprep.subr.bf16.mxu1 %v3175_v26  ;;  %2317 = vmatprep.subr.bf16.mxu0 %v3178_v27 }
 0x17a   :  { %2232 = vmatpush1.bf16.msra.mxu1 %v3173_v28  ;;  %2318 = vmatpush1.bf16.msra.mxu0 %v3176_v29 }
 0x17b   :  { %2233 = vmatprep.subr.bf16.mxu1 %v3181_v30  ;;  %2319 = vmatprep.subr.bf16.mxu0 %v3184_v31  ;;  %v3203_v30 = vld [vmem:[#allocation8 + $0x380] ss:$28 sps:$4 sm:$0xff]   ;;  %v3206_v31 = vld [vmem:[#allocation8 + $0x388] ss:$28 sps:$4 sm:$0xff]  }
 0x17e   :  { %2234 = vmatpush1.bf16.msra.mxu1 %v3179_v32  ;;  %2320 = vmatpush1.bf16.msra.mxu0 %v3182_v33  ;;  %v3211_v32 = vld [vmem:[#allocation8 + $0x3bc] ss:$28 sps:$4 sm:$0xff]   ;;  %v3214_v33 = vld [vmem:[#allocation8 + $0x3c4] ss:$28 sps:$4 sm:$0xff]  }
 0x17f   :  { %2235 = vmatprep.subr.bf16.mxu1 %v3187_v34  ;;  %2321 = vmatprep.subr.bf16.mxu0 %v3190_v35  ;;  %v3209_v34 = vld [vmem:[#allocation8 + $0x3b8] ss:$28 sps:$4 sm:$0xff]   ;;  %v3212_v35 = vld [vmem:[#allocation8 + $0x3c0] ss:$28 sps:$4 sm:$0xff]  }
 0x182   :  { %2236 = vmatpush1.bf16.msra.mxu1 %v3185_v36  ;;  %2322 = vmatpush1.bf16.msra.mxu0 %v3188_v37  ;;  %v3217_v36 = vld [vmem:[#allocation8 + $0x3f4] ss:$28 sps:$4 sm:$0xff]   ;;  %v3220_v37 = vld [vmem:[#allocation8 + $0x3fc] ss:$28 sps:$4 sm:$0xff]  }
 0x183   :  { %2237 = vmatprep.subr.bf16.mxu1 %v3193_v38  ;;  %2323 = vmatprep.subr.bf16.mxu0 %v3196_v39  ;;  %v3215_v38 = vld [vmem:[#allocation8 + $0x3f0] ss:$28 sps:$4 sm:$0xff]   ;;  %v3218_v39 = vld [vmem:[#allocation8 + $0x3f8] ss:$28 sps:$4 sm:$0xff]  }
 0x186   :  { %2238 = vmatpush1.bf16.msra.mxu1 %v3191_v40  ;;  %2324 = vmatpush1.bf16.msra.mxu0 %v3194_v41  ;;  %v3223_v40 = vld [vmem:[#allocation8 + $0x42c] ss:$28 sps:$4 sm:$0xff]   ;;  %v3226_v41 = vld [vmem:[#allocation8 + $0x434] ss:$28 sps:$4 sm:$0xff]  }
 0x187   :  { %2239 = vmatprep.subr.bf16.mxu1 %v3199_v42  ;;  %2325 = vmatprep.subr.bf16.mxu0 %v3202_v43  ;;  %v3221_v42 = vld [vmem:[#allocation8 + $0x428] ss:$28 sps:$4 sm:$0xff]   ;;  %v3224_v43 = vld [vmem:[#allocation8 + $0x430] ss:$28 sps:$4 sm:$0xff]  }
 0x18a   :  { %2240 = vmatpush1.bf16.msra.mxu1 %v3197_v44  ;;  %2326 = vmatpush1.bf16.msra.mxu0 %v3200_v45  ;;  %v3229_v44 = vld [vmem:[#allocation8 + $0x464] ss:$28 sps:$4 sm:$0xff]   ;;  %v3232_v45 = vld [vmem:[#allocation8 + $0x46c] ss:$28 sps:$4 sm:$0xff]  }
 0x18b   :  { %2252 = vmatprep.subr.bf16.mxu1 %v3205_v46  ;;  %2338 = vmatprep.subr.bf16.mxu0 %v3208_v47  ;;  %v3227_v46 = vld [vmem:[#allocation8 + $0x460] ss:$28 sps:$4 sm:$0xff]   ;;  %v3230_v47 = vld [vmem:[#allocation8 + $0x468] ss:$28 sps:$4 sm:$0xff]  }
 0x220   :  { %v692_v55 = vpop.f32.mrb[0].mxu1  ;;  %v735_v56 = vpop.f32.mrb[4].mxu0 }
 0x221   :  { %v693_v57 = vadd.f32 %v692_v55, %v321_v51  ;;  %v736_v58 = vadd.f32 %v735_v56, %v329_v52  ;;  %v694_v59 = vpop.f32.mrb[1].mxu1  ;;  %v737_v60 = vpop.f32.mrb[5].mxu0  ;;  %v3244_v55 = vld [vmem:[#allocation8 + $0x4dc] ss:$28 sps:$4 sm:$0xff]   ;;  %v3239_v56 = vld [vmem:[#allocation8 + $0x4d0] ss:$28 sps:$4 sm:$0xff]  }
 0x222   :  { %v695_v61 = vadd.f32 %v694_v59, %v325_v53  ;;  %v738_v62 = vadd.f32 %v737_v60, %v333_v54  ;;  %v696_v63 = vpop.f32.mrb[2].mxu1  ;;  %v739_v0 = vpop.f32.mrb[6].mxu0  ;;  %v3250_v59 = vld [vmem:[#allocation8 + $0x514] ss:$28 sps:$4 sm:$0xff]   ;;  %v3245_v60 = vld [vmem:[#allocation8 + $0x508] ss:$28 sps:$4 sm:$0xff]  }
 0x223   :  { %v744_v1 = vmul.f32 0.2, %v693_v57  ;;  %v746_v2 = vmul.f32 0.2, %v736_v58  ;;  %v697_v3 = vadd.f32 %v696_v63, %v321_v51  ;;  %v740_v4 = vadd.f32 %v739_v0, %v329_v52  ;;  %v698_v5 = vpop.f32.mrb[3].mxu1  ;;  %v741_v6 = vpop.f32.mrb[7].mxu0 }
 0x224   :  { %v745_v7 = vmul.f32 0.2, %v695_v61  ;;  %v747_v8 = vmul.f32 0.2, %v738_v62  ;;  %v699_v9 = vadd.f32 %v698_v5, %v325_v53  ;;  %v742_v10 = vadd.f32 %v741_v6, %v333_v54  ;;  %v3238_v51 = vld [vmem:[#allocation8 + $0x4a4] ss:$28 sps:$4 sm:$0xff]  }
 0x225   :  { %v748_v11 = vmul.f32 0.2, %v697_v3  ;;  %v750_v12 = vmul.f32 0.2, %v740_v4  ;;  %v752_v15 = vmax.f32 %v693_v57, %v744_v1  ;;  %v754_v16 = vmax.f32 %v736_v58, %v746_v2  ;;  %v3233_v52 = vld [vmem:[#allocation8 + $0x498] ss:$28 sps:$4 sm:$0xff]  }
 0x226   :  { %v749_v13 = vmul.f32 0.2, %v699_v9  ;;  %v751_v14 = vmul.f32 0.2, %v742_v10  ;;  %v753_v19 = vmax.f32 %v695_v61, %v745_v7  ;;  %v755_v20 = vmax.f32 %v738_v62, %v747_v8  ;;  %v3236_v53 = vld [vmem:[#allocation8 + $0x4a0] ss:$28 sps:$4 sm:$0xff]  }
 0x227   :  { %v756_v17 = vmax.f32 %v697_v3, %v748_v11  ;;  %v758_v18 = vmax.f32 %v740_v4, %v750_v12  ;;  %v3241_v54 = vld [vmem:[#allocation8 + $0x4d4] ss:$28 sps:$4 sm:$0xff]   ;;  %v3247_v58 = vld [vmem:[#allocation8 + $0x50c] ss:$28 sps:$4 sm:$0xff]   ;;  %v3253_v62 = vld [vmem:[#allocation8 + $0x544] ss:$28 sps:$4 sm:$0xff]  }
 0x228   :  { %v757_v23 = vmax.f32 %v699_v9, %v749_v13  ;;  %v759_v25 = vmax.f32 %v742_v10, %v751_v14  ;;  %v3242_v57 = vld [vmem:[#allocation8 + $0x4d8] ss:$28 sps:$4 sm:$0xff]   ;;  %v3248_v61 = vld [vmem:[#allocation8 + $0x510] ss:$28 sps:$4 sm:$0xff]   ;;  %v3251_v0 = vld [vmem:[#allocation8 + $0x540] ss:$28 sps:$4 sm:$0xff]  }
 0x229   :  { %v3701_v26 = vpack.c.bf16 %v756_v17, %v752_v15  ;;  %v3703_v27 = vpack.c.bf16 %v758_v18, %v754_v16  ;;  %v3256_v63 = vld [vmem:[#allocation8 + $0x54c] ss:$28 sps:$4 sm:$0xff]   ;;  %v3259_v2 = vld [vmem:[#allocation8 + $0x57c] ss:$28 sps:$4 sm:$0xff]   ;;  %v3262_v3 = vld [vmem:[#allocation8 + $0x584] ss:$28 sps:$4 sm:$0xff]  }
 0x22a   :  { %v3705_v28 = vpack.c.bf16 %v757_v23, %v753_v19  ;;  %v3707_v29 = vpack.c.bf16 %v759_v25, %v755_v20  ;;  %v3254_v1 = vld [vmem:[#allocation8 + $0x548] ss:$28 sps:$4 sm:$0xff]   ;;  %v3257_v4 = vld [vmem:[#allocation8 + $0x578] ss:$28 sps:$4 sm:$0xff]   ;;  %v3260_v5 = vld [vmem:[#allocation8 + $0x580] ss:$28 sps:$4 sm:$0xff]  }
 0x22b   :  { %v3265_v6 = vld [vmem:[#allocation8 + $0x5b4] ss:$28 sps:$4 sm:$0xff]   ;;  %v3268_v7 = vld [vmem:[#allocation8 + $0x5bc] ss:$28 sps:$4 sm:$0xff]   ;;  %v3271_v10 = vld [vmem:[#allocation8 + $0x5ec] ss:$28 sps:$4 sm:$0xff]  }
 0x22c   :  { %2241 = vmatprep.mubr.bf16.mxu1 %v3705_v28  ;;  %2327 = vmatprep.mubr.bf16.mxu0 %v3705_v28  ;;  %v3263_v8 = vld [vmem:[#allocation8 + $0x5b0] ss:$28 sps:$4 sm:$0xff]   ;;  %v3266_v9 = vld [vmem:[#allocation8 + $0x5b8] ss:$28 sps:$4 sm:$0xff]   ;;  %v3269_v12 = vld [vmem:[#allocation8 + $0x5e8] ss:$28 sps:$4 sm:$0xff]  }
 0x22d   :  { %2242 = vmatmul.mubr.bf16.vlgmr.msra.gmra.mrb[4].mxu1 %v3701_v26  ;;  %2328 = vmatmul.mubr.bf16.vlgmr.msra.gmra.mrb[8].mxu0 %v3701_v26  ;;  %v3274_v11 = vld [vmem:[#allocation8 + $0x5f4] ss:$28 sps:$4 sm:$0xff]   ;;  %v3277_v14 = vld [vmem:[#allocation8 + $0x624] ss:$28 sps:$4 sm:$0xff]   ;;  %v3280_v15 = vld [vmem:[#allocation8 + $0x62c] ss:$28 sps:$4 sm:$0xff]  }
 0x22e   :  { %2253 = vmatpush1.bf16.msra.mxu1 %v3203_v30  ;;  %2339 = vmatpush1.bf16.msra.mxu0 %v3206_v31  ;;  %v3272_v13 = vld [vmem:[#allocation8 + $0x5f0] ss:$28 sps:$4 sm:$0xff]   ;;  %v3275_v16 = vld [vmem:[#allocation8 + $0x620] ss:$28 sps:$4 sm:$0xff]   ;;  %v3278_v17 = vld [vmem:[#allocation8 + $0x628] ss:$28 sps:$4 sm:$0xff]  }
 0x22f   :  { %2284 = vmatprep.mubr.bf16.mxu1 %v3707_v29  ;;  %2370 = vmatprep.mubr.bf16.mxu0 %v3707_v29  ;;  %v3283_v18 = vld [vmem:[#allocation8 + $0x65c] ss:$28 sps:$4 sm:$0xff]   ;;  %v3286_v19 = vld [vmem:[#allocation8 + $0x664] ss:$28 sps:$4 sm:$0xff]   ;;  %v3289_v25 = vld [vmem:[#allocation8 + $0x694] ss:$28 sps:$4 sm:$0xff]  }
 0x230   :  { %2254 = vmatprep.subr.bf16.mxu1 %v3211_v32  ;;  %2340 = vmatprep.subr.bf16.mxu0 %v3214_v33  ;;  %v3281_v20 = vld [vmem:[#allocation8 + $0x658] ss:$28 sps:$4 sm:$0xff]   ;;  %v3284_v23 = vld [vmem:[#allocation8 + $0x660] ss:$28 sps:$4 sm:$0xff]   ;;  %v3287_v31 = vld [vmem:[#allocation8 + $0x690] ss:$28 sps:$4 sm:$0xff]  }
 0x231   :  { %v3292_v30 = vld [vmem:[#allocation8 + $0x69c] ss:$28 sps:$4 sm:$0xff]   ;;  %v3295_v33 = vld [vmem:[#allocation8 + $0x6cc] ss:$28 sps:$4 sm:$0xff]  }
 0x232   :  { %2255 = vmatpush1.bf16.msra.mxu1 %v3209_v34  ;;  %2341 = vmatpush1.bf16.msra.mxu0 %v3212_v35  ;;  %v3290_v32 = vld [vmem:[#allocation8 + $0x698] ss:$28 sps:$4 sm:$0xff]   ;;  %v3293_v35 = vld [vmem:[#allocation8 + $0x6c8] ss:$28 sps:$4 sm:$0xff]  }
 0x233   :  { %2256 = vmatprep.subr.bf16.mxu1 %v3217_v36  ;;  %2342 = vmatprep.subr.bf16.mxu0 %v3220_v37  ;;  %v3298_v34 = vld [vmem:[#allocation8 + $0x6d4] ss:$28 sps:$4 sm:$0xff]  }
 0x234   :  { %v3296_v36 = vld [vmem:[#allocation8 + $0x6d0] ss:$28 sps:$4 sm:$0xff]  }
 0x235   :  { %v3301_v37 = vld [vmem:[#allocation8 + $0x14] ss:$28 sps:$4 sm:$0xff]  }
 0x236   :  { %2257 = vmatpush1.bf16.msra.mxu1 %v3215_v38  ;;  %2343 = vmatpush1.bf16.msra.mxu0 %v3218_v39  ;;  %v3302_v38 = vld [vmem:[#allocation8 + $0x1d8] ss:$28 sps:$4 sm:$0xff]   ;;  %v3299_v39 = vld [vmem:[#allocation8 + $0x10] ss:$28 sps:$4 sm:$0xff]  }
 0x237   :  { %2258 = vmatprep.subr.bf16.mxu1 %v3223_v40  ;;  %2344 = vmatprep.subr.bf16.mxu0 %v3226_v41  ;;  %v3303_v40 = vld [vmem:[#allocation8 + $0x18] ss:$28 sps:$4 sm:$0xff]   ;;  %v3306_v41 = vld [vmem:[#allocation8 + $0x4c] ss:$28 sps:$4 sm:$0xff]  }
 0x23a   :  { %2259 = vmatpush1.bf16.msra.mxu1 %v3221_v42  ;;  %2345 = vmatpush1.bf16.msra.mxu0 %v3224_v43  ;;  %v3307_v42 = vld [vmem:[#allocation8 + $0x210] ss:$28 sps:$4 sm:$0xff]   ;;  %v3304_v43 = vld [vmem:[#allocation8 + $0x48] ss:$28 sps:$4 sm:$0xff]  }
 0x23b   :  { %2260 = vmatprep.subr.bf16.mxu1 %v3229_v44  ;;  %2346 = vmatprep.subr.bf16.mxu0 %v3232_v45  ;;  %v3308_v44 = vld [vmem:[#allocation8 + $0x50] ss:$28 sps:$4 sm:$0xff]   ;;  %v3311_v45 = vld [vmem:[#allocation8 + $0x84] ss:$28 sps:$4 sm:$0xff]  }
 0x23e   :  { %2261 = vmatpush1.bf16.msra.mxu1 %v3227_v46  ;;  %2347 = vmatpush1.bf16.msra.mxu0 %v3230_v47  ;;  %v3312_v46 = vld [vmem:[#allocation8 + $0x248] ss:$28 sps:$4 sm:$0xff]   ;;  %v3309_v47 = vld [vmem:[#allocation8 + $0x80] ss:$28 sps:$4 sm:$0xff]  }
 0x23f   :  { %2262 = vmatprep.subr.bf16.mxu1 %v3235_v49  ;;  %2348 = vmatprep.subr.bf16.mxu0 %v3238_v51  ;;  %v3313_v49 = vld [vmem:[#allocation8 + $0x88] ss:$28 sps:$4 sm:$0xff]   ;;  %v3316_v51 = vld [vmem:[#allocation8 + $0xbc] ss:$28 sps:$4 sm:$0xff]  }
 0x242   :  { %2263 = vmatpush1.bf16.msra.mxu1 %v3233_v52  ;;  %2349 = vmatpush1.bf16.msra.mxu0 %v3236_v53  ;;  %v3317_v52 = vld [vmem:[#allocation8 + $0x280] ss:$28 sps:$4 sm:$0xff]   ;;  %v3314_v53 = vld [vmem:[#allocation8 + $0xb8] ss:$28 sps:$4 sm:$0xff]  }
 0x243   :  { %2264 = vmatprep.subr.bf16.mxu1 %v3241_v54  ;;  %2350 = vmatprep.subr.bf16.mxu0 %v3244_v55  ;;  %v3318_v54 = vld [vmem:[#allocation8 + $0xc0] ss:$28 sps:$4 sm:$0xff]   ;;  %v3321_v55 = vld [vmem:[#allocation8 + $0xf4] ss:$28 sps:$4 sm:$0xff]  }
 0x246   :  { %2265 = vmatpush1.bf16.msra.mxu1 %v3239_v56  ;;  %2351 = vmatpush1.bf16.msra.mxu0 %v3242_v57  ;;  %v3319_v56 = vld [vmem:[#allocation8 + $0xf0] ss:$28 sps:$4 sm:$0xff]   ;;  %v3323_v57 = vld [vmem:[#allocation8 + $0xf8] ss:$28 sps:$4 sm:$0xff]  }
 0x247   :  { %2266 = vmatprep.subr.bf16.mxu1 %v3247_v58  ;;  %2352 = vmatprep.subr.bf16.mxu0 %v3250_v59  ;;  %v3326_v58 = vld [vmem:[#allocation8 + $0x12c] ss:$28 sps:$4 sm:$0xff]  }
 0x248   :  { %v3327_v59 = vld [vmem:[#allocation8 + $0x2f0] ss:$28 sps:$4 sm:$0xff]  }
 0x24a   :  { %2267 = vmatpush1.bf16.msra.mxu1 %v3245_v60  ;;  %2353 = vmatpush1.bf16.msra.mxu0 %v3248_v61  ;;  %v3324_v60 = vld [vmem:[#allocation8 + $0x128] ss:$28 sps:$4 sm:$0xff]   ;;  %v3328_v61 = vld [vmem:[#allocation8 + $0x130] ss:$28 sps:$4 sm:$0xff]  }
 0x24b   :  { %2268 = vmatprep.subr.bf16.mxu1 %v3253_v62  ;;  %2354 = vmatprep.subr.bf16.mxu0 %v3256_v63  ;;  %v3331_v62 = vld [vmem:[#allocation8 + $0x164] ss:$28 sps:$4 sm:$0xff]  }
 0x24c   :  { %v3332_v63 = vld [vmem:[#allocation8 + $0x328] ss:$28 sps:$4 sm:$0xff]  }
 0x24e   :  { %2269 = vmatpush1.bf16.msra.mxu1 %v3251_v0  ;;  %2355 = vmatpush1.bf16.msra.mxu0 %v3254_v1  ;;  %v3329_v0 = vld [vmem:[#allocation8 + $0x160] ss:$28 sps:$4 sm:$0xff]   ;;  %v3333_v1 = vld [vmem:[#allocation8 + $0x168] ss:$28 sps:$4 sm:$0xff]  }
 0x24f   :  { %2270 = vmatprep.subr.bf16.mxu1 %v3259_v2  ;;  %2356 = vmatprep.subr.bf16.mxu0 %v3262_v3  ;;  %v3336_v2 = vld [vmem:[#allocation8 + $0x19c] ss:$28 sps:$4 sm:$0xff]  }
 0x250   :  { %v3337_v3 = vld [vmem:[#allocation8 + $0x360] ss:$28 sps:$4 sm:$0xff]  }
 0x252   :  { %2271 = vmatpush1.bf16.msra.mxu1 %v3257_v4  ;;  %2357 = vmatpush1.bf16.msra.mxu0 %v3260_v5  ;;  %v3334_v4 = vld [vmem:[#allocation8 + $0x198] ss:$28 sps:$4 sm:$0xff]   ;;  %v3338_v5 = vld [vmem:[#allocation8 + $0x1a0] ss:$28 sps:$4 sm:$0xff]  }
 0x253   :  { %2272 = vmatprep.subr.bf16.mxu1 %v3265_v6  ;;  %2358 = vmatprep.subr.bf16.mxu0 %v3268_v7  ;;  %v3341_v6 = vld [vmem:[#allocation8 + $0x1d4] ss:$28 sps:$4 sm:$0xff]  }
 0x254   :  { %v3342_v7 = vld [vmem:[#allocation8 + $0x558] ss:$28 sps:$4 sm:$0xff]  }
 0x256   :  { %2273 = vmatpush1.bf16.msra.mxu1 %v3263_v8  ;;  %2359 = vmatpush1.bf16.msra.mxu0 %v3266_v9  ;;  %v3339_v8 = vld [vmem:[#allocation8 + $0x1d0] ss:$28 sps:$4 sm:$0xff]   ;;  %v3343_v9 = vld [vmem:[#allocation8 + $0x398] ss:$28 sps:$4 sm:$0xff]  }
 0x257   :  { %2274 = vmatprep.subr.bf16.mxu1 %v3271_v10  ;;  %2360 = vmatprep.subr.bf16.mxu0 %v3274_v11  ;;  %v3346_v10 = vld [vmem:[#allocation8 + $0x20c] ss:$28 sps:$4 sm:$0xff]  }
 0x258   :  { %v3347_v11 = vld [vmem:[#allocation8 + $0x590] ss:$28 sps:$4 sm:$0xff]  }
 0x25a   :  { %2275 = vmatpush1.bf16.msra.mxu1 %v3269_v12  ;;  %2361 = vmatpush1.bf16.msra.mxu0 %v3272_v13  ;;  %v3344_v12 = vld [vmem:[#allocation8 + $0x208] ss:$28 sps:$4 sm:$0xff]   ;;  %v3348_v13 = vld [vmem:[#allocation8 + $0x3d0] ss:$28 sps:$4 sm:$0xff]  }
 0x25b   :  { %2276 = vmatprep.subr.bf16.mxu1 %v3277_v14  ;;  %2362 = vmatprep.subr.bf16.mxu0 %v3280_v15  ;;  %v3351_v14 = vld [vmem:[#allocation8 + $0x244] ss:$28 sps:$4 sm:$0xff]  }
 0x25c   :  { %v3352_v15 = vld [vmem:[#allocation8 + $0x5c8] ss:$28 sps:$4 sm:$0xff]  }
 0x25e   :  { %2277 = vmatpush1.bf16.msra.mxu1 %v3275_v16  ;;  %2363 = vmatpush1.bf16.msra.mxu0 %v3278_v17  ;;  %v3349_v16 = vld [vmem:[#allocation8 + $0x240] ss:$28 sps:$4 sm:$0xff]   ;;  %v3353_v17 = vld [vmem:[#allocation8 + $0x408] ss:$28 sps:$4 sm:$0xff]  }
 0x25f   :  { %2278 = vmatprep.subr.bf16.mxu1 %v3283_v18  ;;  %2364 = vmatprep.subr.bf16.mxu0 %v3286_v19  ;;  %v3356_v18 = vld [vmem:[#allocation8 + $0x27c] ss:$28 sps:$4 sm:$0xff]  }
 0x260   :  { %v3357_v19 = vld [vmem:[#allocation8 + $0x600] ss:$28 sps:$4 sm:$0xff]  }
 0x262   :  { %2279 = vmatpush1.bf16.msra.mxu1 %v3281_v20  ;;  %2365 = vmatpush1.bf16.msra.mxu0 %v3284_v23  ;;  %v3354_v20 = vld [vmem:[#allocation8 + $0x278] ss:$28 sps:$4 sm:$0xff]   ;;  %v3358_v23 = vld [vmem:[#allocation8 + $0x440] ss:$28 sps:$4 sm:$0xff]  }
 0x263   :  { %2280 = vmatprep.subr.bf16.mxu1 %v3289_v25  ;;  %2366 = vmatprep.subr.bf16.mxu0 %v3292_v30  ;;  %v3361_v25 = vld [vmem:[#allocation8 + $0x2b4] ss:$28 sps:$4 sm:$0xff]  }
 0x264   :  { %v3362_v30 = vld [vmem:[#allocation8 + $0x638] ss:$28 sps:$4 sm:$0xff]  }
 0x266   :  { %2281 = vmatpush1.bf16.msra.mxu1 %v3287_v31  ;;  %2367 = vmatpush1.bf16.msra.mxu0 %v3290_v32  ;;  %v3359_v31 = vld [vmem:[#allocation8 + $0x2b0] ss:$28 sps:$4 sm:$0xff]   ;;  %v3363_v32 = vld [vmem:[#allocation8 + $0x478] ss:$28 sps:$4 sm:$0xff]  }
 0x267   :  { %2282 = vmatprep.subr.bf16.mxu1 %v3295_v33  ;;  %2368 = vmatprep.subr.bf16.mxu0 %v3298_v34  ;;  %v3366_v33 = vld [vmem:[#allocation8 + $0x2ec] ss:$28 sps:$4 sm:$0xff]  }
 0x268   :  { %v3367_v34 = vld [vmem:[#allocation8 + $0x670] ss:$28 sps:$4 sm:$0xff]  }
 0x26a   :  { %2283 = vmatpush1.bf16.msra.mxu1 %v3293_v35  ;;  %2369 = vmatpush1.bf16.msra.mxu0 %v3296_v36  ;;  %v3364_v35 = vld [vmem:[#allocation8 + $0x2e8] ss:$28 sps:$4 sm:$0xff]   ;;  %v3368_v36 = vld [vmem:[#allocation8 + $0x4b0] ss:$28 sps:$4 sm:$0xff]  }
 0x26b   :  { %2381 = vmatprep.subr.bf16.mxu1 %v3301_v37  ;;  %2902 = vmatprep.subr.bf16.mxu0 %v3302_v38  ;;  %v3371_v37 = vld [vmem:[#allocation8 + $0x324] ss:$28 sps:$4 sm:$0xff]  }
 0x26c   :  { %v3372_v38 = vld [vmem:[#allocation8 + $0x6a8] ss:$28 sps:$4 sm:$0xff]  }
 0x26d   :  { %2285 = vmatmul.mubr.bf16.vlgmr.msra.gmra.mrb[4].mxu1 %v3703_v27  ;;  %2371 = vmatmul.mubr.bf16.vlgmr.msra.gmra.mrb[8].mxu0 %v3703_v27 }
 0x26e   :  { %2382 = vmatpush1.bf16.msra.mxu1 %v3299_v39  ;;  %2413 = vmatprep.mubr.bf16.mxu1 %v3705_v28  ;;  %v3369_v39 = vld [vmem:[#allocation8 + $0x320] ss:$28 sps:$4 sm:$0xff]  }
 0x26f   :  { %2903 = vmatpush3.bf16.msra.mxu0 %v3303_v40  ;;  %2499 = vmatprep.mubr.bf16.mxu0 %v3705_v28  ;;  %v3322_v28 = vld [vmem:[#allocation8 + $0x2b8] ss:$28 sps:$4 sm:$0xff]   ;;  %v3373_v40 = vld [vmem:[#allocation8 + $0x4e8] ss:$28 sps:$4 sm:$0xff]  }
 0x270   :  { %2383 = vmatprep.subr.bf16.mxu1 %v3306_v41  ;;  %2904 = vmatprep.subr.bf16.mxu0 %v3307_v42  ;;  %v3376_v41 = vld [vmem:[#allocation8 + $0x35c] ss:$28 sps:$4 sm:$0xff]  }
 0x271   :  { %v3377_v42 = vld [vmem:[#allocation8 + $0x6e0] ss:$28 sps:$4 sm:$0xff]  }
 0x272   :  { %2384 = vmatpush1.bf16.msra.mxu1 %v3304_v43  ;;  %v3374_v43 = vld [vmem:[#allocation8 + $0x358] ss:$28 sps:$4 sm:$0xff]  }
 0x273   :  { %2905 = vmatpush3.bf16.msra.mxu0 %v3308_v44  ;;  %2385 = vmatprep.subr.bf16.mxu1 %v3311_v45  ;;  %v3378_v44 = vld [vmem:[#allocation8 + $0x520] ss:$28 sps:$4 sm:$0xff]   ;;  %v3381_v45 = vld [vmem:[#allocation8 + $0x394] ss:$28 sps:$4 sm:$0xff]  }
 0x274   :  { %2906 = vmatprep.subr.bf16.mxu0 %v3312_v46  ;;  %v3379_v46 = vld [vmem:[#allocation8 + $0x390] ss:$28 sps:$4 sm:$0xff]  }
 0x276   :  { %2386 = vmatpush1.bf16.msra.mxu1 %v3309_v47  ;;  %v3384_v47 = vld [vmem:[#allocation8 + $0x3cc] ss:$28 sps:$4 sm:$0xff]  }
 0x277   :  { %2907 = vmatpush3.bf16.msra.mxu0 %v3313_v49  ;;  %2387 = vmatprep.subr.bf16.mxu1 %v3316_v51  ;;  %v3382_v49 = vld [vmem:[#allocation8 + $0x3c8] ss:$28 sps:$4 sm:$0xff]  }
 0x278   :  { %2908 = vmatprep.subr.bf16.mxu0 %v3317_v52  ;;  %v3387_v51 = vld [vmem:[#allocation8 + $0x404] ss:$28 sps:$4 sm:$0xff]  }
 0x279   :  { %v3385_v52 = vld [vmem:[#allocation8 + $0x400] ss:$28 sps:$4 sm:$0xff]  }
 0x27a   :  { %2388 = vmatpush1.bf16.msra.mxu1 %v3314_v53  ;;  %v3390_v53 = vld [vmem:[#allocation8 + $0x43c] ss:$28 sps:$4 sm:$0xff]  }
 0x27b   :  { %2909 = vmatpush3.bf16.msra.mxu0 %v3318_v54  ;;  %2389 = vmatprep.subr.bf16.mxu1 %v3321_v55  ;;  %v3388_v54 = vld [vmem:[#allocation8 + $0x438] ss:$28 sps:$4 sm:$0xff]  }
 0x27c   :  { %2910 = vmatprep.subr.bf16.mxu0 %v3322_v28  ;;  %v3393_v55 = vld [vmem:[#allocation8 + $0x474] ss:$28 sps:$4 sm:$0xff]  }
 0x27d   :  { %v3391_v28 = vld [vmem:[#allocation8 + $0x470] ss:$28 sps:$4 sm:$0xff]  }
 0x27e   :  { %2390 = vmatpush1.bf16.msra.mxu1 %v3319_v56  ;;  %v3394_v56 = vld [vmem:[#allocation8 + $0x4a8] ss:$28 sps:$4 sm:$0xff]  }
 0x27f   :  { %2911 = vmatpush3.bf16.msra.mxu0 %v3323_v57  ;;  %2391 = vmatprep.subr.bf16.mxu1 %v3326_v58  ;;  %v3399_v57 = vld [vmem:[#allocation8 + $0x4e4] ss:$28 sps:$4 sm:$0xff]   ;;  %v3402_v58 = vld [vmem:[#allocation8 + $0x51c] ss:$28 sps:$4 sm:$0xff]  }
 0x280   :  { %2912 = vmatprep.subr.bf16.mxu0 %v3327_v59  ;;  %v3400_v59 = vld [vmem:[#allocation8 + $0x518] ss:$28 sps:$4 sm:$0xff]  }
 0x282   :  { %2392 = vmatpush1.bf16.msra.mxu1 %v3324_v60  ;;  %v3405_v60 = vld [vmem:[#allocation8 + $0x554] ss:$28 sps:$4 sm:$0xff]  }
 0x283   :  { %2913 = vmatpush3.bf16.msra.mxu0 %v3328_v61  ;;  %2393 = vmatprep.subr.bf16.mxu1 %v3331_v62  ;;  %v3403_v61 = vld [vmem:[#allocation8 + $0x550] ss:$28 sps:$4 sm:$0xff]  }
 0x284   :  { %2914 = vmatprep.subr.bf16.mxu0 %v3332_v63  ;;  %v3408_v62 = vld [vmem:[#allocation8 + $0x58c] ss:$28 sps:$4 sm:$0xff]  }
 0x285   :  { %v3406_v63 = vld [vmem:[#allocation8 + $0x588] ss:$28 sps:$4 sm:$0xff]  }
 0x286   :  { %2394 = vmatpush1.bf16.msra.mxu1 %v3329_v0  ;;  %v3411_v0 = vld [vmem:[#allocation8 + $0x5c4] ss:$28 sps:$4 sm:$0xff]  }
 0x287   :  { %2915 = vmatpush3.bf16.msra.mxu0 %v3333_v1  ;;  %2395 = vmatprep.subr.bf16.mxu1 %v3336_v2  ;;  %v3409_v1 = vld [vmem:[#allocation8 + $0x5c0] ss:$28 sps:$4 sm:$0xff]  }
 0x288   :  { %2916 = vmatprep.subr.bf16.mxu0 %v3337_v3  ;;  %v3414_v2 = vld [vmem:[#allocation8 + $0x5fc] ss:$28 sps:$4 sm:$0xff]  }
 0x289   :  { %v3412_v3 = vld [vmem:[#allocation8 + $0x5f8] ss:$28 sps:$4 sm:$0xff]  }
 0x28a   :  { %2396 = vmatpush1.bf16.msra.mxu1 %v3334_v4  ;;  %v3417_v4 = vld [vmem:[#allocation8 + $0x634] ss:$28 sps:$4 sm:$0xff]  }
 0x28b   :  { %2917 = vmatpush3.bf16.msra.mxu0 %v3338_v5  ;;  %2397 = vmatprep.subr.bf16.mxu1 %v3341_v6  ;;  %v3415_v5 = vld [vmem:[#allocation8 + $0x630] ss:$28 sps:$4 sm:$0xff]  }
 0x28c   :  { %2924 = vmatprep.subr.bf16.mxu0 %v3342_v7  ;;  %v3420_v6 = vld [vmem:[#allocation8 + $0x66c] ss:$28 sps:$4 sm:$0xff]  }
 0x28d   :  { %v3418_v7 = vld [vmem:[#allocation8 + $0x668] ss:$28 sps:$4 sm:$0xff]  }
 0x28e   :  { %2500 = vmatmul.mubr.bf16.vlgmr.msra.gmra.mrb[12].mxu0 %v3701_v26  ;;  %2398 = vmatpush1.bf16.msra.mxu1 %v3339_v8  ;;  %v3423_v8 = vld [vmem:[#allocation8 + $0x6a4] ss:$28 sps:$4 sm:$0xff]  }
 0x28f   :  { %2925 = vmatpush3.bf16.msra.mxu0 %v3343_v9  ;;  %2540 = vmatprep.mubr.bf16.mxu0 %v3707_v29  ;;  %v3421_v9 = vld [vmem:[#allocation8 + $0x6a0] ss:$28 sps:$4 sm:$0xff]  }
 0x290   :  { %2399 = vmatprep.subr.bf16.mxu1 %v3346_v10  ;;  %2926 = vmatprep.subr.bf16.mxu0 %v3347_v11  ;;  %v3426_v10 = vld [vmem:[#allocation8 + $0x6dc] ss:$28 sps:$4 sm:$0xff]  }
 0x291   :  { %v3424_v11 = vld [vmem:[#allocation8 + $0x6d8] ss:$28 sps:$4 sm:$0xff]  }
 0x292   :  { %2400 = vmatpush1.bf16.msra.mxu1 %v3344_v12  ;;  %v3728_v12 = vld [vmem:[%s3764_s6] sm:$0xff]  ;;  %s3586_s6 = smov [#allocation10]  }
 0x293   :  { %2927 = vmatpush3.bf16.msra.mxu0 %v3348_v13  ;;  %2401 = vmatprep.subr.bf16.mxu1 %v3351_v14  ;;  %v1025_v13 = vrot.slane %v3728_v12, %v3680_v22  ;;  %v1033_v14 = vrot.slane %v3728_v12, %v328_v48  ;;  %s2583_s10 = sshll.u32 %s3586_s6, 4  ;;  %s2584_s10 = int_to_ptr.vmem [resolvable:$true] %s2583_s10 }
 0x294   :  { %2928 = vmatprep.subr.bf16.mxu0 %v3352_v15  ;;  %v1029_v15 = vrot.slane %v3728_v12, %v3686_v24  ;;  %s3543_s11 = scalar_lea.vmem %s2584_s10, 1792  ;;  %p3548_p5 = scmp.lt.s32.totalorder %s2584_s10, %s2584_s10 }
 0x295   :  { %p3544_p4 = scmp.ne.s32.totalorder %s2584_s10, %s3543_s11  ;;  %p3549_p6 = scmp.lt.s32.totalorder %s3543_s11, %s3543_s11 }
 0x296   :  { %2402 = vmatpush1.bf16.msra.mxu1 %v3349_v16  ;;  %v1037_v16 = vrot.slane %v3728_v12, %v332_v50 }
 0x297   :  { %2929 = vmatpush3.bf16.msra.mxu0 %v3353_v17  ;;  %2403 = vmatprep.subr.bf16.mxu1 %v3356_v18  ;;  %p3550_p7 = por %p3549_p6, %p3548_p5 }
 0x298   :  { %2930 = vmatprep.subr.bf16.mxu0 %v3357_v19 }
 0x299   :  { %p3551_p8 = pnand %p3550_p7, %p3544_p4 }
 0x29a   :  { %2404 = vmatpush1.bf16.msra.mxu1 %v3354_v20 }
 0x29b   :  { %2931 = vmatpush3.bf16.msra.mxu0 %v3358_v23  ;;  %2405 = vmatprep.subr.bf16.mxu1 %v3361_v25 }
 0x29c   :  { %2932 = vmatprep.subr.bf16.mxu0 %v3362_v30 }
 0x29e   :  { %2406 = vmatpush1.bf16.msra.mxu1 %v3359_v31 }
 0x29f   :  { %2933 = vmatpush3.bf16.msra.mxu0 %v3363_v32  ;;  %2407 = vmatprep.subr.bf16.mxu1 %v3366_v33 }
 0x2a0   :  { %2934 = vmatprep.subr.bf16.mxu0 %v3367_v34 }
 0x2a2   :  { %2408 = vmatpush1.bf16.msra.mxu1 %v3364_v35 }
 0x2a3   :  { %2935 = vmatpush3.bf16.msra.mxu0 %v3368_v36  ;;  %2409 = vmatprep.subr.bf16.mxu1 %v3371_v37 }
 0x2a4   :  { %2936 = vmatprep.subr.bf16.mxu0 %v3372_v38 }
 0x2a6   :  { %2410 = vmatpush1.bf16.msra.mxu1 %v3369_v39 }
 0x2a7   :  { %2937 = vmatpush3.bf16.msra.mxu0 %v3373_v40  ;;  %2411 = vmatprep.subr.bf16.mxu1 %v3376_v41 }
 0x2a8   :  { %2938 = vmatprep.subr.bf16.mxu0 %v3377_v42 }
 0x2aa   :  { %2412 = vmatpush1.bf16.msra.mxu1 %v3374_v43 }
 0x2ab   :  { %2939 = vmatpush3.bf16.msra.mxu0 %v3378_v44  ;;  %2424 = vmatprep.subr.bf16.mxu1 %v3381_v45 }
 0x2ad   :  { %2414 = vmatmul.mubr.bf16.vlgmr.msra.gmra.mrb[8].mxu1 %v3701_v26  ;;  %v3396_v26 = vld [vmem:[#allocation8 + $0x4ac] ss:$28 sps:$4 sm:$0xff]  }
 0x2ae   :  { %2541 = vmatmul.mubr.bf16.vlgmr.msra.gmra.mrb[16].mxu0 %v3703_v27  ;;  %2425 = vmatpush1.bf16.msra.mxu1 %v3379_v46 }
 0x2af   :  { %2456 = vmatprep.mubr.bf16.mxu1 %v3707_v29  ;;  %2426 = vmatprep.subr.bf16.mxu1 %v3384_v47  ;;  %v3397_v29 = vld [vmem:[#allocation8 + $0x4e0] ss:$28 sps:$4 sm:$0xff]  }
 0x2b2   :  { %2427 = vmatpush1.bf16.msra.mxu1 %v3382_v49 }
 0x2b3   :  { %2428 = vmatprep.subr.bf16.mxu1 %v3387_v51  ;;  %v1048_v51 = vsub.s32 6, %v3677_v21 }
 0x2b6   :  { %2429 = vmatpush1.bf16.msra.mxu1 %v3385_v52  ;;  %v1049_v52 = vrot.slane %v3728_v12, %v1048_v51 }
 0x2b7   :  { %2430 = vmatprep.subr.bf16.mxu1 %v3390_v53 }
 0x2ba   :  { %2431 = vmatpush1.bf16.msra.mxu1 %v3388_v54 }
 0x2bb   :  { %2432 = vmatprep.subr.bf16.mxu1 %v3393_v55 }
 0x2be   :  { %2433 = vmatpush1.bf16.msra.mxu1 %v3391_v28 }
 0x2bf   :  { %2434 = vmatprep.subr.bf16.mxu1 %v3396_v26 }
 0x2c2   :  { %2435 = vmatpush1.bf16.msra.mxu1 %v3394_v56 }
 0x2c3   :  { %2436 = vmatprep.subr.bf16.mxu1 %v3399_v57 }
 0x2c6   :  { %2437 = vmatpush1.bf16.msra.mxu1 %v3397_v29 }
 0x2c7   :  { %2438 = vmatprep.subr.bf16.mxu1 %v3402_v58 }
 0x2ca   :  { %2439 = vmatpush1.bf16.msra.mxu1 %v3400_v59 }
 0x2cb   :  { %2440 = vmatprep.subr.bf16.mxu1 %v3405_v60 }
 0x2ce   :  { %2441 = vmatpush1.bf16.msra.mxu1 %v3403_v61 }
 0x2cf   :  { %2442 = vmatprep.subr.bf16.mxu1 %v3408_v62  ;;  %v1040_v62 = vsub.s32 4, %v3677_v21 }
 0x2d2   :  { %2443 = vmatpush1.bf16.msra.mxu1 %v3406_v63  ;;  %v1044_v63 = vsub.s32 5, %v3677_v21 }
 0x2d3   :  { %2444 = vmatprep.subr.bf16.mxu1 %v3411_v0  ;;  %v1041_v0 = vrot.slane %v3728_v12, %v1040_v62 }
 0x2d6   :  { %2445 = vmatpush1.bf16.msra.mxu1 %v3409_v1  ;;  %v1045_v1 = vrot.slane %v3728_v12, %v1044_v63 }
 0x2d7   :  { %2446 = vmatprep.subr.bf16.mxu1 %v3414_v2 }
 0x2da   :  { %2447 = vmatpush1.bf16.msra.mxu1 %v3412_v3 }
 0x2db   :  { %2448 = vmatprep.subr.bf16.mxu1 %v3417_v4 }
 0x2de   :  { %2449 = vmatpush1.bf16.msra.mxu1 %v3415_v5 }
 0x2df   :  { %2450 = vmatprep.subr.bf16.mxu1 %v3420_v6 }
 0x2e2   :  { %2451 = vmatpush1.bf16.msra.mxu1 %v3418_v7 }
 0x2e3   :  { %2452 = vmatprep.subr.bf16.mxu1 %v3423_v8 }
 0x2e6   :  { %2453 = vmatpush1.bf16.msra.mxu1 %v3421_v9 }
 0x2e7   :  { %2454 = vmatprep.subr.bf16.mxu1 %v3426_v10 }
 0x2ea   :  { %2455 = vmatpush1.bf16.msra.mxu1 %v3424_v11 }
 0x2ed   :  { %2457 = vmatmul.mubr.bf16.vlgmr.msra.gmra.mrb[8].mxu1 %v3703_v27 }
 0x340   :  { %v2286_v27 = vpop.f32.mrb[4].mxu1  ;;  %v2372_v17 = vpop.f32.mrb[8].mxu0 }
 0x341   :  { %v2946_v18 = vadd.f32 %v2286_v27, %v1025_v13  ;;  %v2950_v19 = vadd.f32 %v2372_v17, %v1033_v14  ;;  %v2288_v20 = vpop.f32.mrb[5].mxu1  ;;  %v2374_v23 = vpop.f32.mrb[9].mxu0 }
 0x342   :  { %v2947_v25 = vadd.f32 %v2288_v20, %v1029_v15  ;;  %v2951_v30 = vadd.f32 %v2374_v23, %v1037_v16  ;;  %v2290_v22 = vpop.f32.mrb[6].mxu1  ;;  %v2376_v31 = vpop.f32.mrb[10].mxu0 }
 0x343   :  { %3427 = vtanh.f32 %v2946_v18  ;;  %v2948_v32 = vadd.f32 %v2290_v22, %v1025_v13  ;;  %v2292_v48 = vpop.f32.mrb[7].mxu1  ;;  %v2378_v33 = vpop.f32.mrb[11].mxu0  ;;  %v2952_v24 = vadd.f32 %v2376_v31, %v1033_v14 }
 0x344   :  { %3429 = vtanh.f32 %v2950_v19  ;;  %v2949_v34 = vadd.f32 %v2292_v48, %v1029_v15  ;;  %v2953_v50 = vadd.f32 %v2378_v33, %v1037_v16 }
 0x345   :  { %3431 = vtanh.f32 %v2947_v25 }
 0x346   :  { %3433 = vtanh.f32 %v2951_v30 }
 0x347   :  { %3435 = vtanh.f32 %v2948_v32 }
 0x348   :  { %3437 = vtanh.f32 %v2952_v24 }
 0x349   :  { %3439 = vtanh.f32 %v2949_v34 }
 0x34a   :  { %3441 = vtanh.f32 %v2953_v50 }
 0x34d   :  { %v3428_v35 = vpop.eup %3427 }
 0x34e   :  { %v3430_v36 = vpop.eup %3429  ;;  %2563 = vst [vmem:[#allocation10] sm:$0xff] %v3428_v35 }
 0x34f   :  { %v3432_v37 = vpop.eup %3431  ;;  %2565 = vst [vmem:[#allocation10 + $0x10] sm:$0xff] %v3430_v36 }
 0x350   :  { %v3434_v38 = vpop.eup %3433  ;;  %2564 = vst [vmem:[#allocation10 + $0x8] sm:$0xff] %v3432_v37 }
 0x351   :  { %v3436_v39 = vpop.eup %3435  ;;  %2566 = vst [vmem:[#allocation10 + $0x18] sm:$0xff] %v3434_v38 }
 0x352   :  { %v3438_v40 = vpop.eup %3437  ;;  %2571 = vst [vmem:[#allocation10 + $0x38] sm:$0xff] %v3436_v39 }
 0x353   :  { %v3440_v41 = vpop.eup %3439  ;;  %2573 = vst [vmem:[#allocation10 + $0x48] sm:$0xff] %v3438_v40 }
 0x354   :  { %v3442_v42 = vpop.eup %3441  ;;  %2572 = vst [vmem:[#allocation10 + $0x40] sm:$0xff] %v3440_v41 }
 0x355   :  { %2574 = vst [vmem:[#allocation10 + $0x50] sm:$0xff] %v3442_v42 }
 0x361   :  { %v2918_v43 = vpop.f32.mrb[12].mxu0 }
 0x362   :  { %v2919_v44 = vpop.f32.mrb[13].mxu0 }
 0x363   :  { %v2920_v45 = vadd.f32 %v2919_v44, %v2918_v43  ;;  %v2921_v46 = vpop.f32.mrb[14].mxu0 }
 0x364   :  { %v2922_v47 = vpop.f32.mrb[15].mxu0 }
 0x365   :  { %v2923_v49 = vadd.f32 %v2922_v47, %v2921_v46  ;;  %v2502_v55 = vadd.f32 %v2920_v45, %v1049_v52 }
 0x367   :  { %v2505_v57 = vadd.f32 %v2923_v49, %v1049_v52 }
 0x381   :  { %v2940_v53 = vpop.f32.mrb[16].mxu0 }
 0x382   :  { %v2941_v54 = vpop.f32.mrb[17].mxu0 }
 0x383   :  { %v2942_v28 = vadd.f32 %v2941_v54, %v2940_v53  ;;  %v2943_v26 = vpop.f32.mrb[18].mxu0 }
 0x384   :  { %v2944_v56 = vpop.f32.mrb[19].mxu0 }
 0x385   :  { %v2543_v29 = vadd.f32 %v2942_v28, %v2502_v55  ;;  %v2945_v58 = vadd.f32 %v2944_v56, %v2943_v26 }
 0x387   :  { %3443 = vtanh.f32 %v2543_v29  ;;  %v2546_v59 = vadd.f32 %v2945_v58, %v2505_v57 }
 0x389   :  { %3445 = vtanh.f32 %v2546_v59 }
 0x391   :  { %v3444_v60 = vpop.eup %3443 }
 0x392   :  { %2570 = vst.msk [vmem:[#allocation10 + $0x30] sm:$0xff] %vm2569_vm0, %v3444_v60 }
 0x393   :  { %v3446_v61 = vpop.eup %3445 }
 0x394   :  { %2577 = vst.msk [vmem:[#allocation10 + $0x68] sm:$0xff] %vm2569_vm0, %v3446_v61 }
 0x3c0   :  { %v2458_v2 = vpop.f32.mrb[8].mxu1 }
 0x3c1   :  { %v2954_v3 = vadd.f32 %v2458_v2, %v1041_v0  ;;  %v2460_v4 = vpop.f32.mrb[9].mxu1 }
 0x3c2   :  { %v2955_v5 = vadd.f32 %v2460_v4, %v1045_v1  ;;  %v2462_v6 = vpop.f32.mrb[10].mxu1 }
 0x3c3   :  { %3447 = vtanh.f32 %v2954_v3  ;;  %v2956_v7 = vadd.f32 %v2462_v6, %v1041_v0  ;;  %v2464_v8 = vpop.f32.mrb[11].mxu1 }
 0x3c4   :  { %3449 = vtanh.f32 %v2955_v5  ;;  %v2957_v9 = vadd.f32 %v2464_v8, %v1045_v1 }
 0x3c5   :  { %3451 = vtanh.f32 %v2956_v7 }
 0x3c6   :  { %3453 = vtanh.f32 %v2957_v9 }
 0x3cd   :  { %v3448_v10 = vpop.eup %3447 }
 0x3ce   :  { %v3450_v21 = vpop.eup %3449  ;;  %2567 = vst [vmem:[#allocation10 + $0x20] sm:$0xff] %v3448_v10 }
 0x3cf   :  { %v3452_v11 = vpop.eup %3451  ;;  %2568 = vst [vmem:[#allocation10 + $0x28] sm:$0xff] %v3450_v21 }
 0x3d0   :  { %v3454_v12 = vpop.eup %3453  ;;  %2575 = vst [vmem:[#allocation10 + $0x58] sm:$0xff] %v3452_v11 }
 0x3d1   :  { %2576 = vst [vmem:[#allocation10 + $0x60] sm:$0xff] %v3454_v12 }
 0x3d2   :  { %3554 = shalt.err (!%p3551_p8)
}
 0x3d3   :  { %s3555_s14 = scalar_lea.hbm %s3765_s7, 1792 }
 0x3d4   :  { %p3556_p9 = scmp.ne.s32.totalorder %s3765_s7, %s3555_s14  ;;  %p3559_p10 = scmp.lt.u32.totalorder %s3555_s14, %s3765_s7 }
 0x3d6   :  { %p3561_p11 = pnand %p3559_p10, %p3556_p9 }
 0x3d8   :  { %3564 = shalt.err (!%p3561_p11)
}
 0x3d9   :  { %s3587_s18 = smov 896   ;;  %s3588_s19 = smov 56  }
 0x3da   :  { %2589 = dma.vmem_to_hbm [thread:$0]  %s2584_s10, 1792, %s3765_s7, [#allocation4], %s3587_s18, %s3587_s18, %s3588_s19  }
 0x3db   :  { %3571 = dma.done.wait [#allocation4], 1792  }
 0x3dc   :  { %3572 = vsyncadd [#allocation4], 4294965504 }
 0x3dd   :  { %2593 = vsyncpa [#allocation3], 1 }
 0x3de   :  { %2594 = vsyncpa [#allocation6], 1 }
 0x3df   :  { %2595 = vsyncpa [#allocation9], 1 }
 0x3e0   :  { %2596 = vsyncpa [#allocation4], 1 }

</bundles_post_ra>
